<compile_context>
chip_gen: v7x
topology: tpu7x:2x2x1
jax: 0.10.0
libtpu: 0.0.40
codegen_flags: <defaults>
</compile_context>

<pallas_src>
import jax
import jax.numpy as jnp
from jax import lax
from jax.experimental import pallas as pl
from jax.experimental.pallas import tpu as pltpu


# ----------------------------------------------------------------------------
# Pallas kernel: (Cout, K) @ (K, L_tile) matmul + BN affine (+ residual) (+ ReLU)
# ----------------------------------------------------------------------------
def _make_kernel(relu, has_residual):
    def kernel(*refs):
        if has_residual:
            p_ref, w_ref, scale_ref, shift_ref, res_ref, o_ref = refs
        else:
            p_ref, w_ref, scale_ref, shift_ref, o_ref = refs
        # Single fused-tap MXU matmul over the whole batch, f32 accumulation.
        y = jnp.dot(w_ref[...], p_ref[...], preferred_element_type=jnp.float32)
        y = y * scale_ref[...] + shift_ref[...]          # folded BatchNorm (f32)
        if has_residual:
            y = y + res_ref[...].astype(jnp.float32)
        if relu:
            y = jnp.maximum(y, 0.0)
        o_ref[...] = y.astype(o_ref.dtype)
    return kernel


def _pick_lane_tile(L, max_tile=2048):
    """Lane tile of the flattened (batch*spatial) axis; multiple of 128 when tiling."""
    if L <= max_tile:
        return L
    t = (max_tile // 128) * 128
    while t >= 128:
        if L % t == 0:
            return t
        t -= 128
    return L


def conv_as_matmul(patches, w_mat, scale, shift, *, relu, residual=None,
                   out_dtype=jnp.bfloat16):
    """patches: (K, L) bf16; w_mat: (Cout, K) bf16; scale/shift: (Cout,) f32;
    residual: (Cout, L) bf16 or None.  Returns (Cout, L) in out_dtype."""
    K, L = patches.shape
    Cout = w_mat.shape[0]
    Lt = _pick_lane_tile(L)
    grid = (L // Lt,)

    kernel = _make_kernel(relu, residual is not None)
    in_specs = [
        pl.BlockSpec((K, Lt), lambda s: (0, s)),
        pl.BlockSpec((Cout, K), lambda s: (0, 0)),
        pl.BlockSpec((Cout, 1), lambda s: (0, 0)),
        pl.BlockSpec((Cout, 1), lambda s: (0, 0)),
    ]
    args = [patches, w_mat, scale.reshape(Cout, 1), shift.reshape(Cout, 1)]
    if residual is not None:
        in_specs.append(pl.BlockSpec((Cout, Lt), lambda s: (0, s)))
        args.append(residual)

    return pl.pallas_call(
        kernel,
        out_shape=jax.ShapeDtypeStruct((Cout, L), out_dtype),
        grid=grid,
        in_specs=in_specs,
        out_specs=pl.BlockSpec((Cout, Lt), lambda s: (0, s)),
        compiler_params=pltpu.CompilerParams(
            dimension_semantics=("parallel",)),
    )(*args)


# ----------------------------------------------------------------------------
# Glue: padding / stride-aware im2col / transposed-conv dilation / weight packing
# Activations are channel-major: (C, N, D, H, W).
# ----------------------------------------------------------------------------
def _im2col(xp, out_spatial, strides):
    """xp: (Cin, N, Dp, Hp, Wp) padded (pre-dilated for transposed convs).
    Returns (27*Cin, N*Do*Ho*Wo) patch matrix; K ordering = tap-major, Cin-minor."""
    Cin, N, Dp, Hp, Wp = xp.shape
    Do, Ho, Wo = out_spatial
    sd, sh, sw = strides
    cols = []
    for kd in range(3):
        for kh in range(3):
            for kw in range(3):
                cols.append(xp[:, :,
                               kd:kd + (Do - 1) * sd + 1:sd,
                               kh:kh + (Ho - 1) * sh + 1:sh,
                               kw:kw + (Wo - 1) * sw + 1:sw])
    p = jnp.stack(cols, axis=0)                           # (27, Cin, N, Do, Ho, Wo)
    return p.reshape(27 * Cin, N * Do * Ho * Wo)


def _pad1(x):                                             # conv padding = 1 on D, H, W
    return jnp.pad(x, ((0, 0), (0, 0), (1, 1), (1, 1), (1, 1)))


def _dilate_pad_transpose(x):
    # ConvTranspose3d(k=3, stride=(1,2,2), pad=1, output_padding=(0,1,1)) as a
    # stride-1 conv: dilate H/W by 2, pad D (1,1), H/W low 1, high 1+output_padding.
    C, N, D, H, W = x.shape
    xd = jnp.zeros((C, N, D, 2 * H - 1, 2 * W - 1), x.dtype)
    xd = xd.at[:, :, :, ::2, ::2].set(x)
    return jnp.pad(xd, ((0, 0), (0, 0), (1, 1), (1, 2), (1, 2)))


def conv_w_to_mat(w):         # (Cout, Cin, 3,3,3) -> (Cout, 27*Cin), tap-major K
    Cout, Cin = w.shape[:2]
    return jnp.transpose(w, (0, 2, 3, 4, 1)).reshape(Cout, 27 * Cin)


def convT_w_to_mat(w):        # (Cin, Cout, 3,3,3) -> (Cout, 27*Cin) for equiv. conv
    Cin, Cout = w.shape[:2]
    wf = w[:, :, ::-1, ::-1, ::-1]
    return jnp.transpose(wf, (1, 2, 3, 4, 0)).reshape(Cout, 27 * Cin)


# ----------------------------------------------------------------------------
# Deterministic parameter init (synthetic, mirrors HourGlass.__init__ shapes)
# ----------------------------------------------------------------------------
def init_params(key, C):
    keys = jax.random.split(key, 64)
    it = iter(keys)

    def nrm(shape, s=0.1):
        return s * jax.random.normal(next(it), shape, jnp.float32)

    def bn_fold(c):                                       # inference-mode BN fold
        gamma = 1.0 + nrm((c,))
        beta = nrm((c,))
        mean = jnp.zeros((c,), jnp.float32)
        var = jnp.ones((c,), jnp.float32)
        s = gamma / jnp.sqrt(var + 1e-5)
        return s, beta - mean * s

    def fold2(sa, ba, sb, bb):                            # BN2(BN1(x))
        return sb * sa, sb * ba + bb

    P = {}

    def pack(name, w_raw, w_mat, s, b):
        P[name] = dict(w_raw=w_raw, w_mat=w_mat.astype(jnp.bfloat16),
                       scale=s, shift=b)

    for name, cin, cout in [("first_a", C, C), ("first_b", C, C)]:
        w = nrm((cout, cin, 3, 3, 3))
        s1, b1 = bn_fold(cout)
        s2, b2 = bn_fold(cout)
        s, b = fold2(s1, b1, s2, b2)
        pack(name, w, conv_w_to_mat(w), s, b)
    for name, cin, cout in [("conv1", C, 2 * C), ("conv2", 2 * C, 2 * C),
                            ("conv3", 2 * C, 4 * C), ("conv4", 4 * C, 4 * C)]:
        w = nrm((cout, cin, 3, 3, 3))
        s, b = bn_fold(cout)
        pack(name, w, conv_w_to_mat(w), s, b)
    for name, cin, cout in [("conv5", 4 * C, 2 * C), ("conv6", 2 * C, C)]:
        w = nrm((cin, cout, 3, 3, 3))                     # ConvTranspose3d weight layout
        s, b = bn_fold(cout)
        pack(name, w, convT_w_to_mat(w), s, b)
    return P


# ----------------------------------------------------------------------------
# HourGlass forward (Pallas path) — NCDHW in / NCDHW out (PyTorch-native layout)
# ----------------------------------------------------------------------------
@jax.jit
def hourglass_forward(x_ncdhw, params):
    # Channel-major, batch-in-lanes internal layout: (C, N, D, H, W).
    x = jnp.transpose(x_ncdhw, (1, 0, 2, 3, 4)).astype(jnp.bfloat16)

    def out_sz(n, s):                                     # k=3, pad=1
        return (n - 1) // s + 1

    def conv_layer(a, name, relu, stride_hw=1, residual=None,
                   out_dtype=jnp.bfloat16):
        p = params[name]
        Cin, Nb, D, H, W = a.shape
        Do, Ho, Wo = D, out_sz(H, stride_hw), out_sz(W, stride_hw)
        patches = _im2col(_pad1(a), (Do, Ho, Wo), (1, stride_hw, stride_hw))
        res = (residual.reshape(-1, Nb * Do * Ho * Wo)
               if residual is not None else None)
        y = conv_as_matmul(patches, p["w_mat"], p["scale"], p["shift"],
                           relu=relu, residual=res, out_dtype=out_dtype)
        return y.reshape(-1, Nb, Do, Ho, Wo)

    def deconv_layer(a, name, relu, residual, out_dtype=jnp.bfloat16):
        p = params[name]
        Cin, Nb, D, H, W = a.shape
        Do, Ho, Wo = D, 2 * H, 2 * W
        patches = _im2col(_dilate_pad_transpose(a), (Do, Ho, Wo), (1, 1, 1))
        res = residual.reshape(-1, Nb * Do * Ho * Wo)
        y = conv_as_matmul(patches, p["w_mat"], p["scale"], p["shift"],
                           relu=relu, residual=res, out_dtype=out_dtype)
        return y.reshape(-1, Nb, Do, Ho, Wo)

    t1 = conv_layer(x, "first_a", True)
    out1 = conv_layer(t1, "first_b", True)
    out2 = conv_layer(out1, "conv1", True, stride_hw=2)
    out3 = conv_layer(out2, "conv2", True)
    out4 = conv_layer(out3, "conv3", True, stride_hw=2)
    out5 = conv_layer(out4, "conv4", True)
    out6 = deconv_layer(out5, "conv5", True, residual=out3)
    out = deconv_layer(out6, "conv6", False, residual=out1, out_dtype=jnp.float32)
    return jnp.transpose(out, (1, 0, 2, 3, 4))            # back to NCDHW


# ----------------------------------------------------------------------------
# Pure-JAX reference (lax.conv_general_dilated) mirroring the bf16 data flow
# ----------------------------------------------------------------------------
@jax.jit
def ref_forward(x_ncdhw, params):
    x = x_ncdhw.astype(jnp.bfloat16)
    dn = ("NCDHW", "OIDHW", "NCDHW")

    def bcast(v):
        return v.reshape(1, -1, 1, 1, 1)

    def cbn(a, name, relu, strides=(1, 1, 1)):
        p = params[name]
        y = lax.conv_general_dilated(
            a, p["w_raw"].astype(jnp.bfloat16), window_strides=strides,
            padding=[(1, 1)] * 3, dimension_numbers=dn,
            preferred_element_type=jnp.float32)
        y = y * bcast(p["scale"]) + bcast(p["shift"])
        if relu:
            y = jnp.maximum(y, 0.0)
        return y.astype(jnp.bfloat16)

    def ctbn(a, name):
        p = params[name]
        w = jnp.transpose(p["w_raw"][:, :, ::-1, ::-1, ::-1],
                          (1, 0, 2, 3, 4)).astype(jnp.bfloat16)
        y = lax.conv_general_dilated(
            a, w, window_strides=(1, 1, 1),
            padding=[(1, 1), (1, 2), (1, 2)], lhs_dilation=(1, 2, 2),
            dimension_numbers=dn, preferred_element_type=jnp.float32)
        return y * bcast(p["scale"]) + bcast(p["shift"])

    t1 = cbn(x, "first_a", True)
    out1 = cbn(t1, "first_b", True)
    out2 = cbn(out1, "conv1", True, strides=(1, 2, 2))
    out3 = cbn(out2, "conv2", True)
    out4 = cbn(out3, "conv3", True, strides=(1, 2, 2))
    out5 = cbn(out4, "conv4", True)
    out6 = jnp.maximum(ctbn(out5, "conv5") + out3.astype(jnp.float32),
                       0.0).astype(jnp.bfloat16)
    out = ctbn(out6, "conv6") + out1.astype(jnp.float32)
    return out


if __name__ == "__main__":
    key = jax.random.PRNGKey(0)
    kx, kp = jax.random.split(key)
    N, C, D, H, W = 2, 4, 4, 8, 8                         # NCDHW, inplanes=4
    x = jax.random.normal(kx, (N, C, D, H, W), jnp.float32)
    params = init_params(kp, C)

    out = jax.block_until_ready(hourglass_forward(x, params))
    ref = jax.block_until_ready(ref_forward(x, params))

    assert out.shape == (N, C, D, H, W), out.shape
    err = float(jnp.max(jnp.abs(out - ref)))
    denom = float(jnp.max(jnp.abs(ref))) + 1e-6
    assert err / denom < 2e-2, f"relative-to-max error too large: {err / denom} (abs {err})"
    print("KERNEL_OK")
</pallas_src>

<mosaic_0001>
module attributes {stable_mosaic.version = 11 : i64} {
  func.func @kernel(%arg0: i32, %arg1: memref<108x512xbf16, #tpu.memory_space<vmem>>, %arg2: memref<4x108xbf16, #tpu.memory_space<vmem>>, %arg3: memref<4x1xf32, #tpu.memory_space<vmem>>, %arg4: memref<4x1xf32, #tpu.memory_space<vmem>>, %arg5: memref<4x512xbf16, #tpu.memory_space<vmem>>) attributes {dimension_semantics = [#tpu.dimension_semantics<parallel>], iteration_bounds = array<i64: 1>, scalar_prefetch = 0 : i64, scratch_operands = 0 : i64, tpu.core_type = #tpu.core_type<tc>, window_params = [{transform_indices = @transform_0, window_bounds = array<i64: 108, 512>}, {pipeline_mode = #tpu.pipeline_mode<synchronous>, transform_indices = @transform_1, window_bounds = array<i64: 4, 108>}, {pipeline_mode = #tpu.pipeline_mode<synchronous>, transform_indices = @transform_2, window_bounds = array<i64: 4, 1>}, {pipeline_mode = #tpu.pipeline_mode<synchronous>, transform_indices = @transform_3, window_bounds = array<i64: 4, 1>}, {transform_indices = @transform_4, window_bounds = array<i64: 4, 512>}]} {
    %c0 = arith.constant 0 : index
    %c0_0 = arith.constant 0 : index
    %0 = vector.load %arg2[%c0, %c0_0] : memref<4x108xbf16, #tpu.memory_space<vmem>>, vector<4x108xbf16>
    %c0_1 = arith.constant 0 : index
    %c0_2 = arith.constant 0 : index
    %1 = vector.load %arg1[%c0_1, %c0_2] : memref<108x512xbf16, #tpu.memory_space<vmem>>, vector<108x512xbf16>
    %cst = arith.constant dense<0.000000e+00> : vector<4x512xf32>
    %2 = tpu.matmul %0, %1, %cst {dimension_numbers = #tpu.dot_dimension_numbers<[1], [0], [0], [1], [0, 0, 1, 1], [], []>} : vector<4x108xbf16>, vector<108x512xbf16>, vector<4x512xf32> -> vector<4x512xf32>
    %c0_3 = arith.constant 0 : index
    %c0_4 = arith.constant 0 : index
    %3 = vector.load %arg3[%c0_3, %c0_4] : memref<4x1xf32, #tpu.memory_space<vmem>>, vector<4x1xf32>
    %4 = vector.broadcast %3 : vector<4x1xf32> to vector<4x512xf32>
    %5 = arith.mulf %2, %4 : vector<4x512xf32>
    %c0_5 = arith.constant 0 : index
    %c0_6 = arith.constant 0 : index
    %6 = vector.load %arg4[%c0_5, %c0_6] : memref<4x1xf32, #tpu.memory_space<vmem>>, vector<4x1xf32>
    %7 = vector.broadcast %6 : vector<4x1xf32> to vector<4x512xf32>
    %8 = arith.addf %5, %7 : vector<4x512xf32>
    %cst_7 = arith.constant 0.000000e+00 : f32
    %9 = vector.broadcast %cst_7 : f32 to vector<4x512xf32>
    %10 = arith.maximumf %8, %9 : vector<4x512xf32>
    %11 = arith.truncf %10 : vector<4x512xf32> to vector<4x512xbf16>
    %c0_8 = arith.constant 0 : index
    %c0_9 = arith.constant 0 : index
    %12 = vector.load %arg5[%c0_8, %c0_9] : memref<4x512xbf16, #tpu.memory_space<vmem>>, vector<4x512xbf16>
    tpu.vector_store %arg5[%c0_8, %c0_9], %11 {strides = array<i32>} : memref<4x512xbf16, #tpu.memory_space<vmem>>, vector<4x512xbf16>,
    return
  }
  func.func @transform_0(%arg0: i32) -> (i32, i32) {
    %c0_i32 = arith.constant 0 : i32
    %c0_i32_0 = arith.constant 0 : i32
    return %c0_i32, %arg0 : i32, i32
  }
  func.func @transform_1(%arg0: i32) -> (i32, i32) {
    %c0_i32 = arith.constant 0 : i32
    %c0_i32_0 = arith.constant 0 : i32
    %c0_i32_1 = arith.constant 0 : i32
    return %c0_i32, %c0_i32_0 : i32, i32
  }
  func.func @transform_2(%arg0: i32) -> (i32, i32) {
    %c0_i32 = arith.constant 0 : i32
    %c0_i32_0 = arith.constant 0 : i32
    %c0_i32_1 = arith.constant 0 : i32
    return %c0_i32, %c0_i32_0 : i32, i32
  }
  func.func @transform_3(%arg0: i32) -> (i32, i32) {
    %c0_i32 = arith.constant 0 : i32
    %c0_i32_0 = arith.constant 0 : i32
    %c0_i32_1 = arith.constant 0 : i32
    return %c0_i32, %c0_i32_0 : i32, i32
  }
  func.func @transform_4(%arg0: i32) -> (i32, i32) {
    %c0_i32 = arith.constant 0 : i32
    %c0_i32_0 = arith.constant 0 : i32
    return %c0_i32, %arg0 : i32, i32
  }
}

module attributes {stable_mosaic.version = 11 : i64} {
  func.func @kernel(%arg0: i32, %arg1: memref<108x128xbf16, #tpu.memory_space<vmem>>, %arg2: memref<8x108xbf16, #tpu.memory_space<vmem>>, %arg3: memref<8x1xf32, #tpu.memory_space<vmem>>, %arg4: memref<8x1xf32, #tpu.memory_space<vmem>>, %arg5: memref<8x128xbf16, #tpu.memory_space<vmem>>) attributes {dimension_semantics = [#tpu.dimension_semantics<parallel>], iteration_bounds = array<i64: 1>, scalar_prefetch = 0 : i64, scratch_operands = 0 : i64, tpu.core_type = #tpu.core_type<tc>, window_params = [{transform_indices = @transform_0, window_bounds = array<i64: 108, 128>}, {pipeline_mode = #tpu.pipeline_mode<synchronous>, transform_indices = @transform_1, window_bounds = array<i64: 8, 108>}, {pipeline_mode = #tpu.pipeline_mode<synchronous>, transform_indices = @transform_2, window_bounds = array<i64: 8, 1>}, {pipeline_mode = #tpu.pipeline_mode<synchronous>, transform_indices = @transform_3, window_bounds = array<i64: 8, 1>}, {transform_indices = @transform_4, window_bounds = array<i64: 8, 128>}]} {
    %c0 = arith.constant 0 : index
    %c0_0 = arith.constant 0 : index
    %0 = vector.load %arg2[%c0, %c0_0] : memref<8x108xbf16, #tpu.memory_space<vmem>>, vector<8x108xbf16>
    %c0_1 = arith.constant 0 : index
    %c0_2 = arith.constant 0 : index
    %1 = vector.load %arg1[%c0_1, %c0_2] : memref<108x128xbf16, #tpu.memory_space<vmem>>, vector<108x128xbf16>
    %cst = arith.constant dense<0.000000e+00> : vector<8x128xf32>
    %2 = tpu.matmul %0, %1, %cst {dimension_numbers = #tpu.dot_dimension_numbers<[1], [0], [0], [1], [0, 0, 1, 1], [], []>} : vector<8x108xbf16>, vector<108x128xbf16>, vector<8x128xf32> -> vector<8x128xf32>
    %c0_3 = arith.constant 0 : index
    %c0_4 = arith.constant 0 : index
    %3 = vector.load %arg3[%c0_3, %c0_4] : memref<8x1xf32, #tpu.memory_space<vmem>>, vector<8x1xf32>
    %4 = vector.broadcast %3 : vector<8x1xf32> to vector<8x128xf32>
    %5 = arith.mulf %2, %4 : vector<8x128xf32>
    %c0_5 = arith.constant 0 : index
    %c0_6 = arith.constant 0 : index
    %6 = vector.load %arg4[%c0_5, %c0_6] : memref<8x1xf32, #tpu.memory_space<vmem>>, vector<8x1xf32>
    %7 = vector.broadcast %6 : vector<8x1xf32> to vector<8x128xf32>
    %8 = arith.addf %5, %7 : vector<8x128xf32>
    %cst_7 = arith.constant 0.000000e+00 : f32
    %9 = vector.broadcast %cst_7 : f32 to vector<8x128xf32>
    %10 = arith.maximumf %8, %9 : vector<8x128xf32>
    %11 = arith.truncf %10 : vector<8x128xf32> to vector<8x128xbf16>
    %c0_8 = arith.constant 0 : index
    %c0_9 = arith.constant 0 : index
    %12 = vector.load %arg5[%c0_8, %c0_9] : memref<8x128xbf16, #tpu.memory_space<vmem>>, vector<8x128xbf16>
    tpu.vector_store %arg5[%c0_8, %c0_9], %11 {strides = array<i32>} : memref<8x128xbf16, #tpu.memory_space<vmem>>, vector<8x128xbf16>,
    return
  }
  func.func @transform_0(%arg0: i32) -> (i32, i32) {
    %c0_i32 = arith.constant 0 : i32
    %c0_i32_0 = arith.constant 0 : i32
    return %c0_i32, %arg0 : i32, i32
  }
  func.func @transform_1(%arg0: i32) -> (i32, i32) {
    %c0_i32 = arith.constant 0 : i32
    %c0_i32_0 = arith.constant 0 : i32
    %c0_i32_1 = arith.constant 0 : i32
    return %c0_i32, %c0_i32_0 : i32, i32
  }
  func.func @transform_2(%arg0: i32) -> (i32, i32) {
    %c0_i32 = arith.constant 0 : i32
    %c0_i32_0 = arith.constant 0 : i32
    %c0_i32_1 = arith.constant 0 : i32
    return %c0_i32, %c0_i32_0 : i32, i32
  }
  func.func @transform_3(%arg0: i32) -> (i32, i32) {
    %c0_i32 = arith.constant 0 : i32
    %c0_i32_0 = arith.constant 0 : i32
    %c0_i32_1 = arith.constant 0 : i32
    return %c0_i32, %c0_i32_0 : i32, i32
  }
  func.func @transform_4(%arg0: i32) -> (i32, i32) {
    %c0_i32 = arith.constant 0 : i32
    %c0_i32_0 = arith.constant 0 : i32
    return %c0_i32, %arg0 : i32, i32
  }
}

module attributes {stable_mosaic.version = 11 : i64} {
  func.func @kernel(%arg0: i32, %arg1: memref<216x128xbf16, #tpu.memory_space<vmem>>, %arg2: memref<8x216xbf16, #tpu.memory_space<vmem>>, %arg3: memref<8x1xf32, #tpu.memory_space<vmem>>, %arg4: memref<8x1xf32, #tpu.memory_space<vmem>>, %arg5: memref<8x128xbf16, #tpu.memory_space<vmem>>) attributes {dimension_semantics = [#tpu.dimension_semantics<parallel>], iteration_bounds = array<i64: 1>, scalar_prefetch = 0 : i64, scratch_operands = 0 : i64, tpu.core_type = #tpu.core_type<tc>, window_params = [{transform_indices = @transform_0, window_bounds = array<i64: 216, 128>}, {pipeline_mode = #tpu.pipeline_mode<synchronous>, transform_indices = @transform_1, window_bounds = array<i64: 8, 216>}, {pipeline_mode = #tpu.pipeline_mode<synchronous>, transform_indices = @transform_2, window_bounds = array<i64: 8, 1>}, {pipeline_mode = #tpu.pipeline_mode<synchronous>, transform_indices = @transform_3, window_bounds = array<i64: 8, 1>}, {transform_indices = @transform_4, window_bounds = array<i64: 8, 128>}]} {
    %c0 = arith.constant 0 : index
    %c0_0 = arith.constant 0 : index
    %0 = vector.load %arg2[%c0, %c0_0] : memref<8x216xbf16, #tpu.memory_space<vmem>>, vector<8x216xbf16>
    %c0_1 = arith.constant 0 : index
    %c0_2 = arith.constant 0 : index
    %1 = vector.load %arg1[%c0_1, %c0_2] : memref<216x128xbf16, #tpu.memory_space<vmem>>, vector<216x128xbf16>
    %cst = arith.constant dense<0.000000e+00> : vector<8x128xf32>
    %2 = tpu.matmul %0, %1, %cst {dimension_numbers = #tpu.dot_dimension_numbers<[1], [0], [0], [1], [0, 0, 1, 1], [], []>} : vector<8x216xbf16>, vector<216x128xbf16>, vector<8x128xf32> -> vector<8x128xf32>
    %c0_3 = arith.constant 0 : index
    %c0_4 = arith.constant 0 : index
    %3 = vector.load %arg3[%c0_3, %c0_4] : memref<8x1xf32, #tpu.memory_space<vmem>>, vector<8x1xf32>
    %4 = vector.broadcast %3 : vector<8x1xf32> to vector<8x128xf32>
    %5 = arith.mulf %2, %4 : vector<8x128xf32>
    %c0_5 = arith.constant 0 : index
    %c0_6 = arith.constant 0 : index
    %6 = vector.load %arg4[%c0_5, %c0_6] : memref<8x1xf32, #tpu.memory_space<vmem>>, vector<8x1xf32>
    %7 = vector.broadcast %6 : vector<8x1xf32> to vector<8x128xf32>
    %8 = arith.addf %5, %7 : vector<8x128xf32>
    %cst_7 = arith.constant 0.000000e+00 : f32
    %9 = vector.broadcast %cst_7 : f32 to vector<8x128xf32>
    %10 = arith.maximumf %8, %9 : vector<8x128xf32>
    %11 = arith.truncf %10 : vector<8x128xf32> to vector<8x128xbf16>
    %c0_8 = arith.constant 0 : index
    %c0_9 = arith.constant 0 : index
    %12 = vector.load %arg5[%c0_8, %c0_9] : memref<8x128xbf16, #tpu.memory_space<vmem>>, vector<8x128xbf16>
    tpu.vector_store %arg5[%c0_8, %c0_9], %11 {strides = array<i32>} : memref<8x128xbf16, #tpu.memory_space<vmem>>, vector<8x128xbf16>,
    return
  }
  func.func @transform_0(%arg0: i32) -> (i32, i32) {
    %c0_i32 = arith.constant 0 : i32
    %c0_i32_0 = arith.constant 0 : i32
    return %c0_i32, %arg0 : i32, i32
  }
  func.func @transform_1(%arg0: i32) -> (i32, i32) {
    %c0_i32 = arith.constant 0 : i32
    %c0_i32_0 = arith.constant 0 : i32
    %c0_i32_1 = arith.constant 0 : i32
    return %c0_i32, %c0_i32_0 : i32, i32
  }
  func.func @transform_2(%arg0: i32) -> (i32, i32) {
    %c0_i32 = arith.constant 0 : i32
    %c0_i32_0 = arith.constant 0 : i32
    %c0_i32_1 = arith.constant 0 : i32
    return %c0_i32, %c0_i32_0 : i32, i32
  }
  func.func @transform_3(%arg0: i32) -> (i32, i32) {
    %c0_i32 = arith.constant 0 : i32
    %c0_i32_0 = arith.constant 0 : i32
    %c0_i32_1 = arith.constant 0 : i32
    return %c0_i32, %c0_i32_0 : i32, i32
  }
  func.func @transform_4(%arg0: i32) -> (i32, i32) {
    %c0_i32 = arith.constant 0 : i32
    %c0_i32_0 = arith.constant 0 : i32
    return %c0_i32, %arg0 : i32, i32
  }
}

module attributes {stable_mosaic.version = 11 : i64} {
  func.func @kernel(%arg0: i32, %arg1: memref<216x32xbf16, #tpu.memory_space<vmem>>, %arg2: memref<16x216xbf16, #tpu.memory_space<vmem>>, %arg3: memref<16x1xf32, #tpu.memory_space<vmem>>, %arg4: memref<16x1xf32, #tpu.memory_space<vmem>>, %arg5: memref<16x32xbf16, #tpu.memory_space<vmem>>) attributes {dimension_semantics = [#tpu.dimension_semantics<parallel>], iteration_bounds = array<i64: 1>, scalar_prefetch = 0 : i64, scratch_operands = 0 : i64, tpu.core_type = #tpu.core_type<tc>, window_params = [{transform_indices = @transform_0, window_bounds = array<i64: 216, 32>}, {pipeline_mode = #tpu.pipeline_mode<synchronous>, transform_indices = @transform_1, window_bounds = array<i64: 16, 216>}, {pipeline_mode = #tpu.pipeline_mode<synchronous>, transform_indices = @transform_2, window_bounds = array<i64: 16, 1>}, {pipeline_mode = #tpu.pipeline_mode<synchronous>, transform_indices = @transform_3, window_bounds = array<i64: 16, 1>}, {transform_indices = @transform_4, window_bounds = array<i64: 16, 32>}]} {
    %c0 = arith.constant 0 : index
    %c0_0 = arith.constant 0 : index
    %0 = vector.load %arg2[%c0, %c0_0] : memref<16x216xbf16, #tpu.memory_space<vmem>>, vector<16x216xbf16>
    %c0_1 = arith.constant 0 : index
    %c0_2 = arith.constant 0 : index
    %1 = vector.load %arg1[%c0_1, %c0_2] : memref<216x32xbf16, #tpu.memory_space<vmem>>, vector<216x32xbf16>
    %cst = arith.constant dense<0.000000e+00> : vector<16x32xf32>
    %2 = tpu.matmul %0, %1, %cst {dimension_numbers = #tpu.dot_dimension_numbers<[1], [0], [0], [1], [0, 0, 1, 1], [], []>} : vector<16x216xbf16>, vector<216x32xbf16>, vector<16x32xf32> -> vector<16x32xf32>
    %c0_3 = arith.constant 0 : index
    %c0_4 = arith.constant 0 : index
    %3 = vector.load %arg3[%c0_3, %c0_4] : memref<16x1xf32, #tpu.memory_space<vmem>>, vector<16x1xf32>
    %4 = vector.broadcast %3 : vector<16x1xf32> to vector<16x32xf32>
    %5 = arith.mulf %2, %4 : vector<16x32xf32>
    %c0_5 = arith.constant 0 : index
    %c0_6 = arith.constant 0 : index
    %6 = vector.load %arg4[%c0_5, %c0_6] : memref<16x1xf32, #tpu.memory_space<vmem>>, vector<16x1xf32>
    %7 = vector.broadcast %6 : vector<16x1xf32> to vector<16x32xf32>
    %8 = arith.addf %5, %7 : vector<16x32xf32>
    %cst_7 = arith.constant 0.000000e+00 : f32
    %9 = vector.broadcast %cst_7 : f32 to vector<16x32xf32>
    %10 = arith.maximumf %8, %9 : vector<16x32xf32>
    %11 = arith.truncf %10 : vector<16x32xf32> to vector<16x32xbf16>
    %c0_8 = arith.constant 0 : index
    %c0_9 = arith.constant 0 : index
    %12 = vector.load %arg5[%c0_8, %c0_9] : memref<16x32xbf16, #tpu.memory_space<vmem>>, vector<16x32xbf16>
    tpu.vector_store %arg5[%c0_8, %c0_9], %11 {strides = array<i32>} : memref<16x32xbf16, #tpu.memory_space<vmem>>, vector<16x32xbf16>,
    return
  }
  func.func @transform_0(%arg0: i32) -> (i32, i32) {
    %c0_i32 = arith.constant 0 : i32
    %c0_i32_0 = arith.constant 0 : i32
    return %c0_i32, %arg0 : i32, i32
  }
  func.func @transform_1(%arg0: i32) -> (i32, i32) {
    %c0_i32 = arith.constant 0 : i32
    %c0_i32_0 = arith.constant 0 : i32
    %c0_i32_1 = arith.constant 0 : i32
    return %c0_i32, %c0_i32_0 : i32, i32
  }
  func.func @transform_2(%arg0: i32) -> (i32, i32) {
    %c0_i32 = arith.constant 0 : i32
    %c0_i32_0 = arith.constant 0 : i32
    %c0_i32_1 = arith.constant 0 : i32
    return %c0_i32, %c0_i32_0 : i32, i32
  }
  func.func @transform_3(%arg0: i32) -> (i32, i32) {
    %c0_i32 = arith.constant 0 : i32
    %c0_i32_0 = arith.constant 0 : i32
    %c0_i32_1 = arith.constant 0 : i32
    return %c0_i32, %c0_i32_0 : i32, i32
  }
  func.func @transform_4(%arg0: i32) -> (i32, i32) {
    %c0_i32 = arith.constant 0 : i32
    %c0_i32_0 = arith.constant 0 : i32
    return %c0_i32, %arg0 : i32, i32
  }
}

module attributes {stable_mosaic.version = 11 : i64} {
  func.func @kernel(%arg0: i32, %arg1: memref<432x32xbf16, #tpu.memory_space<vmem>>, %arg2: memref<16x432xbf16, #tpu.memory_space<vmem>>, %arg3: memref<16x1xf32, #tpu.memory_space<vmem>>, %arg4: memref<16x1xf32, #tpu.memory_space<vmem>>, %arg5: memref<16x32xbf16, #tpu.memory_space<vmem>>) attributes {dimension_semantics = [#tpu.dimension_semantics<parallel>], iteration_bounds = array<i64: 1>, scalar_prefetch = 0 : i64, scratch_operands = 0 : i64, tpu.core_type = #tpu.core_type<tc>, window_params = [{transform_indices = @transform_0, window_bounds = array<i64: 432, 32>}, {pipeline_mode = #tpu.pipeline_mode<synchronous>, transform_indices = @transform_1, window_bounds = array<i64: 16, 432>}, {pipeline_mode = #tpu.pipeline_mode<synchronous>, transform_indices = @transform_2, window_bounds = array<i64: 16, 1>}, {pipeline_mode = #tpu.pipeline_mode<synchronous>, transform_indices = @transform_3, window_bounds = array<i64: 16, 1>}, {transform_indices = @transform_4, window_bounds = array<i64: 16, 32>}]} {
    %c0 = arith.constant 0 : index
    %c0_0 = arith.constant 0 : index
    %0 = vector.load %arg2[%c0, %c0_0] : memref<16x432xbf16, #tpu.memory_space<vmem>>, vector<16x432xbf16>
    %c0_1 = arith.constant 0 : index
    %c0_2 = arith.constant 0 : index
    %1 = vector.load %arg1[%c0_1, %c0_2] : memref<432x32xbf16, #tpu.memory_space<vmem>>, vector<432x32xbf16>
    %cst = arith.constant dense<0.000000e+00> : vector<16x32xf32>
    %2 = tpu.matmul %0, %1, %cst {dimension_numbers = #tpu.dot_dimension_numbers<[1], [0], [0], [1], [0, 0, 1, 1], [], []>} : vector<16x432xbf16>, vector<432x32xbf16>, vector<16x32xf32> -> vector<16x32xf32>
    %c0_3 = arith.constant 0 : index
    %c0_4 = arith.constant 0 : index
    %3 = vector.load %arg3[%c0_3, %c0_4] : memref<16x1xf32, #tpu.memory_space<vmem>>, vector<16x1xf32>
    %4 = vector.broadcast %3 : vector<16x1xf32> to vector<16x32xf32>
    %5 = arith.mulf %2, %4 : vector<16x32xf32>
    %c0_5 = arith.constant 0 : index
    %c0_6 = arith.constant 0 : index
    %6 = vector.load %arg4[%c0_5, %c0_6] : memref<16x1xf32, #tpu.memory_space<vmem>>, vector<16x1xf32>
    %7 = vector.broadcast %6 : vector<16x1xf32> to vector<16x32xf32>
    %8 = arith.addf %5, %7 : vector<16x32xf32>
    %cst_7 = arith.constant 0.000000e+00 : f32
    %9 = vector.broadcast %cst_7 : f32 to vector<16x32xf32>
    %10 = arith.maximumf %8, %9 : vector<16x32xf32>
    %11 = arith.truncf %10 : vector<16x32xf32> to vector<16x32xbf16>
    %c0_8 = arith.constant 0 : index
    %c0_9 = arith.constant 0 : index
    %12 = vector.load %arg5[%c0_8, %c0_9] : memref<16x32xbf16, #tpu.memory_space<vmem>>, vector<16x32xbf16>
    tpu.vector_store %arg5[%c0_8, %c0_9], %11 {strides = array<i32>} : memref<16x32xbf16, #tpu.memory_space<vmem>>, vector<16x32xbf16>,
    return
  }
  func.func @transform_0(%arg0: i32) -> (i32, i32) {
    %c0_i32 = arith.constant 0 : i32
    %c0_i32_0 = arith.constant 0 : i32
    return %c0_i32, %arg0 : i32, i32
  }
  func.func @transform_1(%arg0: i32) -> (i32, i32) {
    %c0_i32 = arith.constant 0 : i32
    %c0_i32_0 = arith.constant 0 : i32
    %c0_i32_1 = arith.constant 0 : i32
    return %c0_i32, %c0_i32_0 : i32, i32
  }
  func.func @transform_2(%arg0: i32) -> (i32, i32) {
    %c0_i32 = arith.constant 0 : i32
    %c0_i32_0 = arith.constant 0 : i32
    %c0_i32_1 = arith.constant 0 : i32
    return %c0_i32, %c0_i32_0 : i32, i32
  }
  func.func @transform_3(%arg0: i32) -> (i32, i32) {
    %c0_i32 = arith.constant 0 : i32
    %c0_i32_0 = arith.constant 0 : i32
    %c0_i32_1 = arith.constant 0 : i32
    return %c0_i32, %c0_i32_0 : i32, i32
  }
  func.func @transform_4(%arg0: i32) -> (i32, i32) {
    %c0_i32 = arith.constant 0 : i32
    %c0_i32_0 = arith.constant 0 : i32
    return %c0_i32, %arg0 : i32, i32
  }
}

module attributes {stable_mosaic.version = 11 : i64} {
  func.func @kernel(%arg0: i32, %arg1: memref<432x128xbf16, #tpu.memory_space<vmem>>, %arg2: memref<8x432xbf16, #tpu.memory_space<vmem>>, %arg3: memref<8x1xf32, #tpu.memory_space<vmem>>, %arg4: memref<8x1xf32, #tpu.memory_space<vmem>>, %arg5: memref<8x128xbf16, #tpu.memory_space<vmem>>, %arg6: memref<8x128xbf16, #tpu.memory_space<vmem>>) attributes {dimension_semantics = [#tpu.dimension_semantics<parallel>], iteration_bounds = array<i64: 1>, scalar_prefetch = 0 : i64, scratch_operands = 0 : i64, tpu.core_type = #tpu.core_type<tc>, window_params = [{transform_indices = @transform_0, window_bounds = array<i64: 432, 128>}, {pipeline_mode = #tpu.pipeline_mode<synchronous>, transform_indices = @transform_1, window_bounds = array<i64: 8, 432>}, {pipeline_mode = #tpu.pipeline_mode<synchronous>, transform_indices = @transform_2, window_bounds = array<i64: 8, 1>}, {pipeline_mode = #tpu.pipeline_mode<synchronous>, transform_indices = @transform_3, window_bounds = array<i64: 8, 1>}, {transform_indices = @transform_4, window_bounds = array<i64: 8, 128>}, {transform_indices = @transform_5, window_bounds = array<i64: 8, 128>}]} {
    %c0 = arith.constant 0 : index
    %c0_0 = arith.constant 0 : index
    %0 = vector.load %arg2[%c0, %c0_0] : memref<8x432xbf16, #tpu.memory_space<vmem>>, vector<8x432xbf16>
    %c0_1 = arith.constant 0 : index
    %c0_2 = arith.constant 0 : index
    %1 = vector.load %arg1[%c0_1, %c0_2] : memref<432x128xbf16, #tpu.memory_space<vmem>>, vector<432x128xbf16>
    %cst = arith.constant dense<0.000000e+00> : vector<8x128xf32>
    %2 = tpu.matmul %0, %1, %cst {dimension_numbers = #tpu.dot_dimension_numbers<[1], [0], [0], [1], [0, 0, 1, 1], [], []>} : vector<8x432xbf16>, vector<432x128xbf16>, vector<8x128xf32> -> vector<8x128xf32>
    %c0_3 = arith.constant 0 : index
    %c0_4 = arith.constant 0 : index
    %3 = vector.load %arg3[%c0_3, %c0_4] : memref<8x1xf32, #tpu.memory_space<vmem>>, vector<8x1xf32>
    %4 = vector.broadcast %3 : vector<8x1xf32> to vector<8x128xf32>
    %5 = arith.mulf %2, %4 : vector<8x128xf32>
    %c0_5 = arith.constant 0 : index
    %c0_6 = arith.constant 0 : index
    %6 = vector.load %arg4[%c0_5, %c0_6] : memref<8x1xf32, #tpu.memory_space<vmem>>, vector<8x1xf32>
    %7 = vector.broadcast %6 : vector<8x1xf32> to vector<8x128xf32>
    %8 = arith.addf %5, %7 : vector<8x128xf32>
    %c0_7 = arith.constant 0 : index
    %c0_8 = arith.constant 0 : index
    %9 = vector.load %arg5[%c0_7, %c0_8] : memref<8x128xbf16, #tpu.memory_space<vmem>>, vector<8x128xbf16>
    %10 = arith.extf %9 : vector<8x128xbf16> to vector<8x128xf32>
    %11 = arith.addf %8, %10 : vector<8x128xf32>
    %cst_9 = arith.constant 0.000000e+00 : f32
    %12 = vector.broadcast %cst_9 : f32 to vector<8x128xf32>
    %13 = arith.maximumf %11, %12 : vector<8x128xf32>
    %14 = arith.truncf %13 : vector<8x128xf32> to vector<8x128xbf16>
    %c0_10 = arith.constant 0 : index
    %c0_11 = arith.constant 0 : index
    %15 = vector.load %arg6[%c0_10, %c0_11] : memref<8x128xbf16, #tpu.memory_space<vmem>>, vector<8x128xbf16>
    tpu.vector_store %arg6[%c0_10, %c0_11], %14 {strides = array<i32>} : memref<8x128xbf16, #tpu.memory_space<vmem>>, vector<8x128xbf16>,
    return
  }
  func.func @transform_0(%arg0: i32) -> (i32, i32) {
    %c0_i32 = arith.constant 0 : i32
    %c0_i32_0 = arith.constant 0 : i32
    return %c0_i32, %arg0 : i32, i32
  }
  func.func @transform_1(%arg0: i32) -> (i32, i32) {
    %c0_i32 = arith.constant 0 : i32
    %c0_i32_0 = arith.constant 0 : i32
    %c0_i32_1 = arith.constant 0 : i32
    return %c0_i32, %c0_i32_0 : i32, i32
  }
  func.func @transform_2(%arg0: i32) -> (i32, i32) {
    %c0_i32 = arith.constant 0 : i32
    %c0_i32_0 = arith.constant 0 : i32
    %c0_i32_1 = arith.constant 0 : i32
    return %c0_i32, %c0_i32_0 : i32, i32
  }
  func.func @transform_3(%arg0: i32) -> (i32, i32) {
    %c0_i32 = arith.constant 0 : i32
    %c0_i32_0 = arith.constant 0 : i32
    %c0_i32_1 = arith.constant 0 : i32
    return %c0_i32, %c0_i32_0 : i32, i32
  }
  func.func @transform_4(%arg0: i32) -> (i32, i32) {
    %c0_i32 = arith.constant 0 : i32
    %c0_i32_0 = arith.constant 0 : i32
    return %c0_i32, %arg0 : i32, i32
  }
  func.func @transform_5(%arg0: i32) -> (i32, i32) {
    %c0_i32 = arith.constant 0 : i32
    %c0_i32_0 = arith.constant 0 : i32
    return %c0_i32, %arg0 : i32, i32
  }
}

module attributes {stable_mosaic.version = 11 : i64} {
  func.func @kernel(%arg0: i32, %arg1: memref<216x512xbf16, #tpu.memory_space<vmem>>, %arg2: memref<4x216xbf16, #tpu.memory_space<vmem>>, %arg3: memref<4x1xf32, #tpu.memory_space<vmem>>, %arg4: memref<4x1xf32, #tpu.memory_space<vmem>>, %arg5: memref<4x512xbf16, #tpu.memory_space<vmem>>, %arg6: memref<4x512xf32, #tpu.memory_space<vmem>>) attributes {dimension_semantics = [#tpu.dimension_semantics<parallel>], iteration_bounds = array<i64: 1>, scalar_prefetch = 0 : i64, scratch_operands = 0 : i64, tpu.core_type = #tpu.core_type<tc>, window_params = [{transform_indices = @transform_0, window_bounds = array<i64: 216, 512>}, {pipeline_mode = #tpu.pipeline_mode<synchronous>, transform_indices = @transform_1, window_bounds = array<i64: 4, 216>}, {pipeline_mode = #tpu.pipeline_mode<synchronous>, transform_indices = @transform_2, window_bounds = array<i64: 4, 1>}, {pipeline_mode = #tpu.pipeline_mode<synchronous>, transform_indices = @transform_3, window_bounds = array<i64: 4, 1>}, {transform_indices = @transform_4, window_bounds = array<i64: 4, 512>}, {transform_indices = @transform_5, window_bounds = array<i64: 4, 512>}]} {
    %c0 = arith.constant 0 : index
    %c0_0 = arith.constant 0 : index
    %0 = vector.load %arg2[%c0, %c0_0] : memref<4x216xbf16, #tpu.memory_space<vmem>>, vector<4x216xbf16>
    %c0_1 = arith.constant 0 : index
    %c0_2 = arith.constant 0 : index
    %1 = vector.load %arg1[%c0_1, %c0_2] : memref<216x512xbf16, #tpu.memory_space<vmem>>, vector<216x512xbf16>
    %cst = arith.constant dense<0.000000e+00> : vector<4x512xf32>
    %2 = tpu.matmul %0, %1, %cst {dimension_numbers = #tpu.dot_dimension_numbers<[1], [0], [0], [1], [0, 0, 1, 1], [], []>} : vector<4x216xbf16>, vector<216x512xbf16>, vector<4x512xf32> -> vector<4x512xf32>
    %c0_3 = arith.constant 0 : index
    %c0_4 = arith.constant 0 : index
    %3 = vector.load %arg3[%c0_3, %c0_4] : memref<4x1xf32, #tpu.memory_space<vmem>>, vector<4x1xf32>
    %4 = vector.broadcast %3 : vector<4x1xf32> to vector<4x512xf32>
    %5 = arith.mulf %2, %4 : vector<4x512xf32>
    %c0_5 = arith.constant 0 : index
    %c0_6 = arith.constant 0 : index
    %6 = vector.load %arg4[%c0_5, %c0_6] : memref<4x1xf32, #tpu.memory_space<vmem>>, vector<4x1xf32>
    %7 = vector.broadcast %6 : vector<4x1xf32> to vector<4x512xf32>
    %8 = arith.addf %5, %7 : vector<4x512xf32>
    %c0_7 = arith.constant 0 : index
    %c0_8 = arith.constant 0 : index
    %9 = vector.load %arg5[%c0_7, %c0_8] : memref<4x512xbf16, #tpu.memory_space<vmem>>, vector<4x512xbf16>
    %10 = arith.extf %9 : vector<4x512xbf16> to vector<4x512xf32>
    %11 = arith.addf %8, %10 : vector<4x512xf32>
    %c0_9 = arith.constant 0 : index
    %c0_10 = arith.constant 0 : index
    %12 = vector.load %arg6[%c0_9, %c0_10] : memref<4x512xf32, #tpu.memory_space<vmem>>, vector<4x512xf32>
    tpu.vector_store %arg6[%c0_9, %c0_10], %11 {strides = array<i32>} : memref<4x512xf32, #tpu.memory_space<vmem>>, vector<4x512xf32>,
    return
  }
  func.func @transform_0(%arg0: i32) -> (i32, i32) {
    %c0_i32 = arith.constant 0 : i32
    %c0_i32_0 = arith.constant 0 : i32
    return %c0_i32, %arg0 : i32, i32
  }
  func.func @transform_1(%arg0: i32) -> (i32, i32) {
    %c0_i32 = arith.constant 0 : i32
    %c0_i32_0 = arith.constant 0 : i32
    %c0_i32_1 = arith.constant 0 : i32
    return %c0_i32, %c0_i32_0 : i32, i32
  }
  func.func @transform_2(%arg0: i32) -> (i32, i32) {
    %c0_i32 = arith.constant 0 : i32
    %c0_i32_0 = arith.constant 0 : i32
    %c0_i32_1 = arith.constant 0 : i32
    return %c0_i32, %c0_i32_0 : i32, i32
  }
  func.func @transform_3(%arg0: i32) -> (i32, i32) {
    %c0_i32 = arith.constant 0 : i32
    %c0_i32_0 = arith.constant 0 : i32
    %c0_i32_1 = arith.constant 0 : i32
    return %c0_i32, %c0_i32_0 : i32, i32
  }
  func.func @transform_4(%arg0: i32) -> (i32, i32) {
    %c0_i32 = arith.constant 0 : i32
    %c0_i32_0 = arith.constant 0 : i32
    return %c0_i32, %arg0 : i32, i32
  }
  func.func @transform_5(%arg0: i32) -> (i32, i32) {
    %c0_i32 = arith.constant 0 : i32
    %c0_i32_0 = arith.constant 0 : i32
    return %c0_i32, %arg0 : i32, i32
  }
}

</mosaic_0001>

<bundles_post_ra>
// kernel: hourglass_forward.8
= control target key start
LH: loop header
LB: loop body
LE: loop exit
PB: predicated region body
PF: predicated region fallthrough
CT: control target
= control target key end

     0   :  { %v416_v1 = vmov 0   ;;  %vm187_vm0 = vcmask 1045504   ;;  %vm183_vm1 = vcmask 883712   ;;  %v417_v35 = vmov 1983009808   ;;  %s539_s0 = inlined_call_operand.vmem [shape: bf16[108,512], index: 0, kind: input, shape index: {}]   ;;  %s540_s2 = inlined_call_operand.vmem [shape: f32[4,1], index: 2, kind: input, shape index: {}]   ;;  %s541_s3 = inlined_call_operand.vmem [shape: f32[4,1], index: 3, kind: input, shape index: {}]   ;;  %s542_s1 = inlined_call_operand.vmem [shape: bf16[4,108], index: 1, kind: input, shape index: {}]   ;;  %s543_s4 = inlined_call_operand.vmem [shape: bf16[4,512], index: 4, kind: output, shape index: {}]  }
   0x1   :  { %v374_v0 = vld [vmem:[%s539_s0 + $0x4] ss:$16 sps:$4 sm:$0xff]   ;;  %232 = vmatprep.mubr.bf16.mxu0 %v416_v1  ;;  %273 = vmatprep.mubr.bf16.mxu1 %v416_v1  ;;  %v376_v2 = vld [vmem:[%s539_s0 + $0xc] ss:$16 sps:$4 sm:$0xff]   ;;  %v378_v3 = vld [vmem:[%s539_s0] ss:$16 sps:$4 sm:$0xff]   ;;  %v317_v36 = vunpack.c.l.s4 %v417_v35  ;;  %v319_v37 = vlaneseq }
   0x2   :  { %373 = vset.pattern.permute.xlu0 %v416_v1  ;;  %200 = vmatprep.subr.bf16.mxu0 %v374_v0  ;;  %v379_v4 = vld [vmem:[%s539_s0 + $0x8] ss:$16 sps:$4 sm:$0xff]   ;;  %v380_v5 = vld [vmem:[%s539_s0 + $0x24] ss:$16 sps:$4 sm:$0xff]   ;;  %v382_v6 = vld [vmem:[%s539_s0 + $0x2c] ss:$16 sps:$4 sm:$0xff]  }
   0x3   :  { %241 = vmatprep.subr.bf16.mxu1 %v376_v2  ;;  %201 = vmatpush1.bf16.msra.mxu0 %v378_v3  ;;  %v384_v7 = vld [vmem:[%s539_s0 + $0x20] ss:$16 sps:$4 sm:$0xff]   ;;  %v385_v8 = vld [vmem:[%s539_s0 + $0x28] ss:$16 sps:$4 sm:$0xff]   ;;  %v386_v9 = vld [vmem:[%s539_s0 + $0x44] ss:$16 sps:$4 sm:$0xff]   ;;  %v318_v46 = vunpack.c.0.s8 %v317_v36 }
   0x4   :  { %242 = vmatpush1.bf16.msra.mxu1 %v379_v4  ;;  %202 = vmatprep.subr.bf16.mxu0 %v380_v5  ;;  %v388_v10 = vld [vmem:[%s539_s0 + $0x4c] ss:$16 sps:$4 sm:$0xff]   ;;  %v390_v11 = vld [vmem:[%s539_s0 + $0x40] ss:$16 sps:$4 sm:$0xff]   ;;  %v391_v12 = vld [vmem:[%s539_s0 + $0x48] ss:$16 sps:$4 sm:$0xff]  }
   0x5   :  { %243 = vmatprep.subr.bf16.mxu1 %v382_v6  ;;  %v392_v13 = vld [vmem:[%s539_s0 + $0x64] ss:$16 sps:$4 sm:$0xff]   ;;  %v394_v14 = vld [vmem:[%s539_s0 + $0x6c] ss:$16 sps:$4 sm:$0xff]   ;;  %v396_v15 = vld [vmem:[%s539_s0 + $0x60] ss:$16 sps:$4 sm:$0xff]  }
   0x6   :  { %v397_v16 = vld [vmem:[%s539_s0 + $0x68] ss:$16 sps:$4 sm:$0xff]   ;;  %v398_v17 = vld [vmem:[%s539_s0 + $0x84] ss:$16 sps:$4 sm:$0xff]   ;;  %v400_v18 = vld [vmem:[%s539_s0 + $0x8c] ss:$16 sps:$4 sm:$0xff]  }
   0x7   :  { %203 = vmatpush1.bf16.msra.mxu0 %v384_v7  ;;  %v402_v19 = vld [vmem:[%s539_s0 + $0x80] ss:$16 sps:$4 sm:$0xff]   ;;  %v403_v20 = vld [vmem:[%s539_s0 + $0x88] ss:$16 sps:$4 sm:$0xff]   ;;  %v404_v21 = vld [vmem:[%s539_s0 + $0xa4] ss:$16 sps:$4 sm:$0xff]  }
   0x8   :  { %244 = vmatpush1.bf16.msra.mxu1 %v385_v8  ;;  %204 = vmatprep.subr.bf16.mxu0 %v386_v9  ;;  %v406_v22 = vld [vmem:[%s539_s0 + $0xac] ss:$16 sps:$4 sm:$0xff]   ;;  %v408_v23 = vld [vmem:[%s539_s0 + $0xa0] ss:$16 sps:$4 sm:$0xff]   ;;  %v409_v24 = vld [vmem:[%s539_s0 + $0xa8] ss:$16 sps:$4 sm:$0xff]  }
   0x9   :  { %245 = vmatprep.subr.bf16.mxu1 %v388_v10  ;;  %v282_v25 = vld [vmem:[%s540_s2] sm:$0xf]  ;;  %v410_v26 = vld [vmem:[%s539_s0 + $0xc4] ss:$16 sps:$4 sm:$0x3f]   ;;  %v320_v47 = vshrl.u32 %v319_v37, 7 }
   0xa   :  { %v412_v27 = vld [vmem:[%s539_s0 + $0xcc] ss:$16 sps:$4 sm:$0x3f]   ;;  %v414_v28 = vld [vmem:[%s539_s0 + $0xc0] ss:$16 sps:$4 sm:$0x3f]   ;;  %285 = vperm.xlu0 %373, %v282_v25  }
   0xb   :  { %205 = vmatpush1.bf16.msra.mxu0 %v390_v11  ;;  %v415_v29 = vld [vmem:[%s539_s0 + $0xc8] ss:$16 sps:$4 sm:$0x3f]   ;;  %v292_v30 = vld [vmem:[%s541_s3] sm:$0xf]  ;;  %v189_v31 = vsel %vm187_vm0, %v414_v28, 0  ;;  %v321_v60 = vsub.s32 %v318_v46, %v320_v47 }
   0xc   :  { %246 = vmatpush1.bf16.msra.mxu1 %v391_v12  ;;  %206 = vmatprep.subr.bf16.mxu0 %v392_v13  ;;  %v195_v32 = vsel %vm187_vm0, %v415_v29, 0  ;;  %v18_v33 = vld [vmem:[%s542_s1] sm:$0x3] }
   0xd   :  { %247 = vmatprep.subr.bf16.mxu1 %v394_v14 }
   0xe   :  { %295 = vperm.xlu0 %373, %v292_v30  }
   0xf   :  { %207 = vmatpush1.bf16.msra.mxu0 %v396_v15 }
  0x10   :  { %248 = vmatpush1.bf16.msra.mxu1 %v397_v16  ;;  %208 = vmatprep.subr.bf16.mxu0 %v398_v17 }
  0x11   :  { %249 = vmatprep.subr.bf16.mxu1 %v400_v18 }
  0x13   :  { %209 = vmatpush1.bf16.msra.mxu0 %v402_v19 }
  0x14   :  { %250 = vmatpush1.bf16.msra.mxu1 %v403_v20  ;;  %210 = vmatprep.subr.bf16.mxu0 %v404_v21 }
  0x15   :  { %251 = vmatprep.subr.bf16.mxu1 %v406_v22 }
  0x17   :  { %211 = vmatpush1.bf16.msra.mxu0 %v408_v23 }
  0x18   :  { %252 = vmatpush1.bf16.msra.mxu1 %v409_v24  ;;  %365 = vmatprep.subr.msk.bf16.mxu0 %vm187_vm0, %v410_v26 }
  0x19   :  { %367 = vmatprep.subr.msk.bf16.mxu1 %vm187_vm0, %v412_v27 }
  0x1b   :  { %213 = vmatpush1.bf16.msra.mxu0 %v189_v31 }
  0x1c   :  { %254 = vmatpush1.bf16.msra.mxu1 %v195_v32 }
  0x1e   :  { %366 = vmatmul.mubr.msk.bf16.vlgmr.msra.gmra.mrb[0].mxu0 %vm183_vm1, %v18_v33 }
  0x1f   :  { %368 = vmatmul.mubr.msk.bf16.vlgmr.msra.gmra.mrb[0].mxu1 %vm183_vm1, %v18_v33 }
  0x89   :  { %v286_v34 = vpop.permute.xlu0 %285 }
  0x8d   :  { %v296_v38 = vpop.permute.xlu0 %295 }
  0xf1   :  { %v234_v39 = vpop.f32.mrb[0].mxu0 }
  0xf2   :  { %v275_v40 = vpop.f32.mrb[0].mxu1  ;;  %v288_v41 = vmul.f32 %v286_v34, %v234_v39  ;;  %v236_v43 = vpop.f32.mrb[1].mxu0 }
  0xf3   :  { %v290_v42 = vmul.f32 %v286_v34, %v275_v40  ;;  %v277_v44 = vpop.f32.mrb[1].mxu1  ;;  %v289_v45 = vmul.f32 %v286_v34, %v236_v43  ;;  %v238_v49 = vpop.f32.mrb[2].mxu0 }
  0xf4   :  { %v291_v48 = vmul.f32 %v286_v34, %v277_v44  ;;  %v279_v50 = vpop.f32.mrb[2].mxu1  ;;  %v298_v51 = vadd.f32 %v296_v38, %v288_v41  ;;  %v239_v53 = vpop.f32.mrb[3].mxu0 }
  0xf5   :  { %v300_v52 = vadd.f32 %v296_v38, %v290_v42  ;;  %v280_v54 = vpop.f32.mrb[3].mxu1  ;;  %v299_v55 = vadd.f32 %v296_v38, %v289_v45 }
  0xf6   :  { %v301_v56 = vadd.f32 %v296_v38, %v291_v48  ;;  %v302_v57 = vmax.f32 %v298_v51, 0.0 }
  0xf7   :  { %v304_v58 = vmax.f32 %v300_v52, 0.0  ;;  %v303_v59 = vmax.f32 %v299_v55, 0.0 }
  0xf8   :  { %v305_v61 = vmax.f32 %v301_v56, 0.0 }
  0xf9   :  { %v369_v62 = vpack.c.bf16 %v303_v59, %v302_v57 }
  0xfa   :  { %v370_v63 = vpack.c.bf16 %v305_v61, %v304_v58 }
  0xfb   :  { %v322_v0 = vrot.slane %v369_v62, %v321_v60 }
  0xfc   :  { %v329_v1 = vrot.slane %v370_v63, %v321_v60 }
  0xfe   :  { %v330_v2 = vcombine.low %v322_v0, %v329_v1 }
 0x100   :  { %332 = vst [vmem:[%s543_s4] sm:$0xff] %v330_v2 }

// kernel: hourglass_forward.10
= control target key start
LH: loop header
LB: loop body
LE: loop exit
PB: predicated region body
PF: predicated region fallthrough
CT: control target
= control target key end

     0   :  { %v188_v0 = vmov 0.0   ;;  %vm189_vm0 = vmmov 0   ;;  %v190_v2 = vmov 0   ;;  %vm78_vm1 = vcmask 1045504   ;;  %s249_s0 = inlined_call_operand.vmem [shape: bf16[108,128], index: 0, kind: input, shape index: {}]   ;;  %s250_s2 = inlined_call_operand.vmem [shape: f32[8,1], index: 2, kind: input, shape index: {}]   ;;  %s251_s3 = inlined_call_operand.vmem [shape: f32[8,1], index: 3, kind: input, shape index: {}]   ;;  %s252_s1 = inlined_call_operand.vmem [shape: bf16[8,108], index: 1, kind: input, shape index: {}]   ;;  %s253_s4 = inlined_call_operand.vmem [shape: bf16[8,128], index: 4, kind: output, shape index: {}]  }
   0x1   :  { %159 = vmatprep.subr.bf16.mxu0 %v188_v0  ;;  %v181_v1 = vld [vmem:[%s249_s0] sm:$0xff]   ;;  %173 = vmatprep.mubr.msk.bf16.mxu0 %vm189_vm0, %v188_v0  ;;  %v182_v3 = vld [vmem:[%s249_s0 + $0x8] sm:$0xff]   ;;  %v183_v4 = vld [vmem:[%s249_s0 + $0x10] sm:$0xff]   ;;  %vm74_vm2 = vcmask 883712  }
   0x2   :  { %180 = vset.pattern.permute.xlu0 %v190_v2  ;;  %160 = vmatpush3.bf16.msra.mxu0 %v181_v1  ;;  %v122_v5 = vld [vmem:[%s250_s2] sm:$0xff]  ;;  %v184_v7 = vld [vmem:[%s249_s0 + $0x18] sm:$0xff]   ;;  %v186_v9 = vld [vmem:[%s249_s0 + $0x28] sm:$0xff]  }
   0x3   :  { %161 = vmatprep.subr.bf16.mxu0 %v188_v0  ;;  %125 = vperm.xlu0 %180, %v122_v5   ;;  %v129_v6 = vld [vmem:[%s251_s3] sm:$0xff]  ;;  %v187_v10 = vld [vmem:[%s249_s0 + $0x30] sm:$0x3f]  }
   0x4   :  { %v185_v8 = vld [vmem:[%s249_s0 + $0x20] sm:$0xff]   ;;  %v80_v11 = vsel %vm78_vm1, %v187_v10, 0 }
   0x5   :  { %v18_v12 = vld [vmem:[%s252_s1] sm:$0xf] }
   0x6   :  { %162 = vmatpush3.bf16.msra.mxu0 %v182_v3 }
   0x7   :  { %163 = vmatprep.subr.bf16.mxu0 %v188_v0  ;;  %132 = vperm.xlu0 %180, %v129_v6  }
   0xa   :  { %164 = vmatpush3.bf16.msra.mxu0 %v183_v4 }
   0xb   :  { %165 = vmatprep.subr.bf16.mxu0 %v188_v0 }
   0xe   :  { %166 = vmatpush3.bf16.msra.mxu0 %v184_v7 }
   0xf   :  { %167 = vmatprep.subr.bf16.mxu0 %v188_v0 }
  0x12   :  { %168 = vmatpush3.bf16.msra.mxu0 %v185_v8 }
  0x13   :  { %169 = vmatprep.subr.bf16.mxu0 %v188_v0 }
  0x16   :  { %170 = vmatpush3.bf16.msra.mxu0 %v186_v9 }
  0x17   :  { %171 = vmatprep.subr.bf16.mxu0 %v188_v0 }
  0x1a   :  { %172 = vmatpush3.bf16.msra.mxu0 %v80_v11 }
  0x1d   :  { %174 = vmatmul.mubr.msk.bf16.vlgmr.msra.gmra.mrb[0].mxu0 %vm74_vm2, %v18_v12 }
  0x82   :  { %v126_v13 = vpop.permute.xlu0 %125 }
  0x86   :  { %v133_v17 = vpop.permute.xlu0 %132 }
  0xf0   :  { %v116_v14 = vpop.f32.mrb[0].mxu0 }
  0xf1   :  { %v128_v15 = vmul.f32 %v126_v13, %v116_v14  ;;  %v175_v16 = vpop.f32.mrb[1].mxu0 }
  0xf2   :  { %v119_v18 = vpop.f32.mrb[2].mxu0 }
  0xf3   :  { %v135_v19 = vadd.f32 %v133_v17, %v128_v15  ;;  %v176_v20 = vpop.f32.mrb[3].mxu0 }
  0xf5   :  { %v136_v21 = vmax.f32 %v135_v19, 0.0 }
  0xf7   :  { %v137_v22 = vpack.c.bf16 %v136_v21, %v136_v21 }
  0xf9   :  { %138 = vst [vmem:[%s253_s4] sm:$0xf] %v137_v22 }

// kernel: hourglass_forward.11
= control target key start
LH: loop header
LB: loop body
LE: loop exit
PB: predicated region body
PF: predicated region fallthrough
CT: control target
= control target key end

     0   :  { %v237_v0 = vmov 0   ;;  %vm133_vm0 = vcmask 719872   ;;  %vm137_vm1 = vcmask 1043456   ;;  %s317_s0 = inlined_call_operand.vmem [shape: bf16[216,128], index: 0, kind: input, shape index: {}]   ;;  %s318_s1 = inlined_call_operand.vmem [shape: bf16[8,216], index: 1, kind: input, shape index: {}]   ;;  %s319_s2 = inlined_call_operand.vmem [shape: f32[8,1], index: 2, kind: input, shape index: {}]   ;;  %s320_s3 = inlined_call_operand.vmem [shape: f32[8,1], index: 3, kind: input, shape index: {}]   ;;  %s321_s4 = inlined_call_operand.vmem [shape: bf16[8,128], index: 4, kind: output, shape index: {}]  }
   0x1   :  { %141 = vmatprep.subr.bf16.mxu0 %v237_v0  ;;  %v221_v1 = vld [vmem:[%s317_s0] sm:$0xff]   ;;  %220 = vset.pattern.permute.xlu0 %v237_v0  ;;  %v222_v2 = vld [vmem:[%s317_s0 + $0x8] sm:$0xff]   ;;  %v223_v3 = vld [vmem:[%s317_s0 + $0x10] sm:$0xff]  }
   0x2   :  { %142 = vmatpush1.bf16.msra.mxu0 %v221_v1  ;;  %v224_v4 = vld [vmem:[%s317_s0 + $0x18] sm:$0xff]   ;;  %v18_v5 = vld [vmem:[%s318_s1] sm:$0xff]  ;;  %v226_v10 = vld [vmem:[%s317_s0 + $0x28] sm:$0xff]  }
   0x3   :  { %143 = vmatprep.subr.bf16.mxu0 %v237_v0  ;;  %v225_v6 = vld [vmem:[%s317_s0 + $0x20] sm:$0xff]   ;;  %v203_v7 = vcombine.high %v18_v5, %v18_v5  ;;  %v227_v11 = vld [vmem:[%s317_s0 + $0x30] sm:$0xff]   ;;  %v228_v12 = vld [vmem:[%s317_s0 + $0x38] sm:$0xff]   ;;  %v202_v20 = vcombine.low %v18_v5, %v18_v5 }
   0x4   :  { %v181_v8 = vld [vmem:[%s319_s2] sm:$0xff]  ;;  %v230_v14 = vld [vmem:[%s317_s0 + $0x48] sm:$0xff]   ;;  %v231_v15 = vld [vmem:[%s317_s0 + $0x50] sm:$0xff]  }
   0x5   :  { %184 = vperm.xlu0 %220, %v181_v8   ;;  %218 = vmatprep.mubr.msk.bf16.mxu0 %vm133_vm0, %v203_v7  ;;  %v188_v9 = vld [vmem:[%s320_s3] sm:$0xff]  ;;  %v232_v16 = vld [vmem:[%s317_s0 + $0x58] sm:$0xff]   ;;  %v234_v18 = vld [vmem:[%s317_s0 + $0x68] ss:$0 sps:$4 sm:$0xff]  }
   0x6   :  { %144 = vmatpush1.bf16.msra.mxu0 %v222_v2  ;;  %v229_v13 = vld [vmem:[%s317_s0 + $0x40] sm:$0xff]   ;;  %v139_v19 = vsel %vm137_vm1, %v234_v18, 0 }
   0x7   :  { %145 = vmatprep.subr.bf16.mxu0 %v237_v0  ;;  %v233_v17 = vld [vmem:[%s317_s0 + $0x60] sm:$0xff]  }
   0x9   :  { %191 = vperm.xlu0 %220, %v188_v9  }
   0xa   :  { %146 = vmatpush1.bf16.msra.mxu0 %v223_v3 }
   0xb   :  { %147 = vmatprep.subr.bf16.mxu0 %v237_v0 }
   0xe   :  { %148 = vmatpush1.bf16.msra.mxu0 %v224_v4 }
   0xf   :  { %149 = vmatprep.subr.bf16.mxu0 %v237_v0 }
  0x12   :  { %150 = vmatpush1.bf16.msra.mxu0 %v225_v6 }
  0x13   :  { %151 = vmatprep.subr.bf16.mxu0 %v237_v0 }
  0x16   :  { %152 = vmatpush1.bf16.msra.mxu0 %v226_v10 }
  0x17   :  { %153 = vmatprep.subr.bf16.mxu0 %v237_v0 }
  0x1a   :  { %154 = vmatpush1.bf16.msra.mxu0 %v227_v11 }
  0x1b   :  { %155 = vmatprep.subr.bf16.mxu0 %v237_v0 }
  0x1e   :  { %156 = vmatpush1.bf16.msra.mxu0 %v228_v12 }
  0x1f   :  { %157 = vmatprep.subr.bf16.mxu0 %v237_v0 }
  0x22   :  { %158 = vmatpush1.bf16.msra.mxu0 %v229_v13 }
  0x23   :  { %159 = vmatprep.subr.bf16.mxu0 %v237_v0 }
  0x26   :  { %160 = vmatpush1.bf16.msra.mxu0 %v230_v14 }
  0x27   :  { %161 = vmatprep.subr.bf16.mxu0 %v237_v0 }
  0x2a   :  { %162 = vmatpush1.bf16.msra.mxu0 %v231_v15 }
  0x2b   :  { %163 = vmatprep.subr.bf16.mxu0 %v237_v0 }
  0x2e   :  { %164 = vmatpush1.bf16.msra.mxu0 %v232_v16 }
  0x2f   :  { %165 = vmatprep.subr.bf16.mxu0 %v237_v0 }
  0x32   :  { %166 = vmatpush1.bf16.msra.mxu0 %v233_v17 }
  0x33   :  { %167 = vmatprep.subr.bf16.mxu0 %v237_v0 }
  0x36   :  { %168 = vmatpush1.bf16.msra.mxu0 %v139_v19 }
  0x39   :  { %174 = vmatmul.mubr.bf16.vlgmr.msra.gmra.mrb[0].mxu0 %v202_v20 }
  0x84   :  { %v185_v21 = vpop.permute.xlu0 %184 }
  0x88   :  { %v192_v25 = vpop.permute.xlu0 %191 }
 0x10c   :  { %v175_v22 = vpop.f32.mrb[0].mxu0 }
 0x10d   :  { %v187_v23 = vmul.f32 %v185_v21, %v175_v22  ;;  %v177_v24 = vpop.f32.mrb[1].mxu0 }
 0x10e   :  { %v178_v26 = vpop.f32.mrb[2].mxu0 }
 0x10f   :  { %v194_v27 = vadd.f32 %v192_v25, %v187_v23  ;;  %v179_v28 = vpop.f32.mrb[3].mxu0 }
 0x111   :  { %v195_v29 = vmax.f32 %v194_v27, 0.0 }
 0x113   :  { %v196_v30 = vpack.c.bf16 %v195_v29, %v195_v29 }
 0x115   :  { %197 = vst [vmem:[%s321_s4] sm:$0xf] %v196_v30 }

// kernel: hourglass_forward.12
= control target key start
LH: loop header
LB: loop body
LE: loop exit
PB: predicated region body
PF: predicated region fallthrough
CT: control target
= control target key end

     0   :  { %v272_v0 = vmov 0   ;;  %vm137_vm0 = vcmask 719872   ;;  %vm141_vm1 = vcmask 1043456   ;;  %vm224_vm2 = vcmask 257024   ;;  %s364_s0 = inlined_call_operand.vmem [shape: bf16[216,32], index: 0, kind: input, shape index: {}]   ;;  %s365_s1 = inlined_call_operand.vmem [shape: bf16[16,216], index: 1, kind: input, shape index: {}]   ;;  %s366_s2 = inlined_call_operand.vmem [shape: f32[16,1], index: 2, kind: input, shape index: {}]   ;;  %s367_s3 = inlined_call_operand.vmem [shape: f32[16,1], index: 3, kind: input, shape index: {}]   ;;  %s368_s4 = inlined_call_operand.vmem [shape: bf16[16,32], index: 4, kind: output, shape index: {}]  }
   0x1   :  { %145 = vmatprep.subr.bf16.mxu0 %v272_v0  ;;  %v255_v1 = vld [vmem:[%s364_s0] sm:$0xff]   ;;  %253 = vset.pattern.permute.xlu0 %v272_v0  ;;  %v256_v2 = vld [vmem:[%s364_s0 + $0x8] sm:$0xff]   ;;  %v257_v3 = vld [vmem:[%s364_s0 + $0x10] sm:$0xff]  }
   0x2   :  { %254 = vset.pattern.permute.xlu1 %v272_v0  ;;  %146 = vmatpush1.bf16.msra.mxu0 %v255_v1  ;;  %v258_v4 = vld [vmem:[%s364_s0 + $0x18] sm:$0xff]   ;;  %v259_v5 = vld [vmem:[%s364_s0 + $0x20] sm:$0xff]   ;;  %v187_v9 = vld [vmem:[%s366_s2 + $0x8] sm:$0xff] }
   0x3   :  { %147 = vmatprep.subr.bf16.mxu0 %v272_v0  ;;  %v271_v6 = vld [vmem:[%s365_s1 + $0x4] ss:$8 sps:$4 sm:$0xff]   ;;  %v261_v12 = vld [vmem:[%s364_s0 + $0x30] sm:$0xff]   ;;  %v262_v13 = vld [vmem:[%s364_s0 + $0x38] sm:$0xff]  }
   0x4   :  { %v186_v7 = vld [vmem:[%s366_s2] sm:$0xff]  ;;  %247 = vmatprep.mubr.msk.bf16.mxu0 %vm137_vm0, %v271_v6  ;;  %v260_v10 = vld [vmem:[%s364_s0 + $0x28] sm:$0xff]   ;;  %v265_v16 = vld [vmem:[%s364_s0 + $0x50] sm:$0xff]  }
   0x5   :  { %v200_v8 = vld [vmem:[%s367_s3] sm:$0xff]  ;;  %190 = vperm.xlu0 %253, %v186_v7   ;;  %v201_v11 = vld [vmem:[%s367_s3 + $0x8] sm:$0xff]  ;;  %v266_v17 = vld [vmem:[%s364_s0 + $0x58] sm:$0xff]  }
   0x6   :  { %148 = vmatpush1.bf16.msra.mxu0 %v256_v2  ;;  %204 = vperm.xlu1 %254, %v200_v8   ;;  %v263_v14 = vld [vmem:[%s364_s0 + $0x40] sm:$0xff]   ;;  %v264_v15 = vld [vmem:[%s364_s0 + $0x48] sm:$0xff]  }
   0x7   :  { %149 = vmatprep.subr.bf16.mxu0 %v272_v0  ;;  %v267_v18 = vld [vmem:[%s364_s0 + $0x60] sm:$0xff]   ;;  %v268_v19 = vld [vmem:[%s364_s0 + $0x68] ss:$0 sps:$4 sm:$0xff]  }
   0x8   :  { %v143_v20 = vsel %vm141_vm1, %v268_v19, 0  ;;  %v269_v21 = vld [vmem:[%s365_s1] ss:$8 sps:$4 sm:$0xff]  }
   0x9   :  { %195 = vperm.xlu0 %253, %v187_v9  }
   0xa   :  { %150 = vmatpush1.bf16.msra.mxu0 %v257_v3  ;;  %209 = vperm.xlu1 %254, %v201_v11  }
   0xb   :  { %151 = vmatprep.subr.bf16.mxu0 %v272_v0 }
   0xe   :  { %152 = vmatpush1.bf16.msra.mxu0 %v258_v4 }
   0xf   :  { %153 = vmatprep.subr.bf16.mxu0 %v272_v0 }
  0x12   :  { %154 = vmatpush1.bf16.msra.mxu0 %v259_v5 }
  0x13   :  { %155 = vmatprep.subr.bf16.mxu0 %v272_v0 }
  0x16   :  { %156 = vmatpush1.bf16.msra.mxu0 %v260_v10 }
  0x17   :  { %157 = vmatprep.subr.bf16.mxu0 %v272_v0 }
  0x1a   :  { %158 = vmatpush1.bf16.msra.mxu0 %v261_v12 }
  0x1b   :  { %159 = vmatprep.subr.bf16.mxu0 %v272_v0 }
  0x1e   :  { %160 = vmatpush1.bf16.msra.mxu0 %v262_v13 }
  0x1f   :  { %161 = vmatprep.subr.bf16.mxu0 %v272_v0 }
  0x22   :  { %162 = vmatpush1.bf16.msra.mxu0 %v263_v14 }
  0x23   :  { %163 = vmatprep.subr.bf16.mxu0 %v272_v0 }
  0x26   :  { %164 = vmatpush1.bf16.msra.mxu0 %v264_v15 }
  0x27   :  { %165 = vmatprep.subr.bf16.mxu0 %v272_v0 }
  0x2a   :  { %166 = vmatpush1.bf16.msra.mxu0 %v265_v16 }
  0x2b   :  { %167 = vmatprep.subr.bf16.mxu0 %v272_v0 }
  0x2e   :  { %168 = vmatpush1.bf16.msra.mxu0 %v266_v17 }
  0x2f   :  { %169 = vmatprep.subr.bf16.mxu0 %v272_v0 }
  0x32   :  { %170 = vmatpush1.bf16.msra.mxu0 %v267_v18 }
  0x33   :  { %171 = vmatprep.subr.bf16.mxu0 %v272_v0 }
  0x36   :  { %172 = vmatpush1.bf16.msra.mxu0 %v143_v20 }
  0x39   :  { %178 = vmatmul.mubr.bf16.vlgmr.msra.gmra.mrb[0].mxu0 %v269_v21 }
  0x84   :  { %v191_v22 = vpop.permute.xlu0 %190 }
  0x85   :  { %v205_v23 = vpop.permute.xlu1 %204 }
  0x88   :  { %v196_v27 = vpop.permute.xlu0 %195 }
  0x89   :  { %v210_v32 = vpop.permute.xlu1 %209 }
 0x10c   :  { %v179_v24 = vpop.f32.mrb[0].mxu0 }
 0x10d   :  { %v198_v25 = vmul.f32 %v191_v22, %v179_v24  ;;  %v181_v26 = vpop.f32.mrb[1].mxu0 }
 0x10e   :  { %v182_v28 = vpop.f32.mrb[2].mxu0 }
 0x10f   :  { %v212_v29 = vadd.f32 %v205_v23, %v198_v25  ;;  %v199_v30 = vmul.f32 %v196_v27, %v182_v28  ;;  %v184_v31 = vpop.f32.mrb[3].mxu0 }
 0x111   :  { %v214_v33 = vmax.f32 %v212_v29, 0.0  ;;  %v213_v34 = vadd.f32 %v210_v32, %v199_v30 }
 0x113   :  { %v250_v35 = vpack.c.bf16 %v214_v33, %v214_v33  ;;  %v215_v36 = vmax.f32 %v213_v34, 0.0 }
 0x115   :  { %225 = vst.msk [vmem:[%s368_s4] sm:$0xf] %vm224_vm2, %v250_v35  ;;  %v251_v37 = vpack.c.bf16 %v215_v36, %v215_v36 }
 0x117   :  { %226 = vst.msk [vmem:[%s368_s4 + $0x4] sm:$0xf] %vm224_vm2, %v251_v37 }

// kernel: hourglass_forward.13
= control target key start
LH: loop header
LB: loop body
LE: loop exit
PB: predicated region body
PF: predicated region fallthrough
CT: control target
= control target key end

     0   :  { %v482_v0 = vmov 0   ;;  %vm257_vm0 = vcmask 392192   ;;  %vm381_vm1 = vcmask 257024   ;;  %s632_s0 = inlined_call_operand.vmem [shape: bf16[432,32], index: 0, kind: input, shape index: {}]   ;;  %s633_s1 = inlined_call_operand.vmem [shape: bf16[16,432], index: 1, kind: input, shape index: {}]   ;;  %s634_s2 = inlined_call_operand.vmem [shape: f32[16,1], index: 2, kind: input, shape index: {}]   ;;  %s635_s3 = inlined_call_operand.vmem [shape: f32[16,1], index: 3, kind: input, shape index: {}]   ;;  %s636_s4 = inlined_call_operand.vmem [shape: bf16[16,32], index: 4, kind: output, shape index: {}]  }
   0x1   :  { %302 = vmatprep.subr.bf16.mxu1 %v482_v0  ;;  %v449_v1 = vld [vmem:[%s632_s0 + $0x80] sm:$0xff]   ;;  %447 = vset.pattern.permute.xlu0 %v482_v0  ;;  %v450_v2 = vld [vmem:[%s632_s0 + $0x88] sm:$0xff]   ;;  %v453_v5 = vld [vmem:[%s632_s0 + $0x90] sm:$0xff]  }
   0x2   :  { %448 = vset.pattern.permute.xlu1 %v482_v0  ;;  %303 = vmatpush1.bf16.msra.mxu1 %v449_v1  ;;  %v451_v3 = vld [vmem:[%s632_s0 + $0x40] sm:$0xff]   ;;  %v454_v6 = vld [vmem:[%s632_s0 + $0x48] sm:$0xff]   ;;  %v457_v8 = vld [vmem:[%s632_s0 + $0x50] sm:$0xff]  }
   0x3   :  { %304 = vmatprep.subr.bf16.mxu1 %v482_v0  ;;  %v452_v4 = vld [vmem:[%s632_s0] sm:$0xff]   ;;  %424 = vmatprep.subr.bf16.mxu0 %v451_v3  ;;  %v455_v7 = vld [vmem:[%s632_s0 + $0x8] sm:$0xff]   ;;  %v458_v9 = vld [vmem:[%s632_s0 + $0x10] sm:$0xff]  }
   0x4   :  { %425 = vmatpush3.bf16.msra.mxu0 %v452_v4  ;;  %v456_v10 = vld [vmem:[%s632_s0 + $0x98] sm:$0xff]   ;;  %v459_v12 = vld [vmem:[%s632_s0 + $0xa0] sm:$0xff]   ;;  %v462_v15 = vld [vmem:[%s632_s0 + $0xa8] sm:$0xff]  }
   0x5   :  { %426 = vmatprep.subr.bf16.mxu0 %v454_v6  ;;  %v460_v11 = vld [vmem:[%s632_s0 + $0x58] sm:$0xff]   ;;  %v463_v14 = vld [vmem:[%s632_s0 + $0x60] sm:$0xff]   ;;  %v466_v17 = vld [vmem:[%s632_s0 + $0x68] sm:$0xff]  }
   0x6   :  { %305 = vmatpush1.bf16.msra.mxu1 %v450_v2  ;;  %v461_v13 = vld [vmem:[%s632_s0 + $0x18] sm:$0xff]   ;;  %v464_v16 = vld [vmem:[%s632_s0 + $0x20] sm:$0xff]   ;;  %v465_v18 = vld [vmem:[%s632_s0 + $0xb0] sm:$0xff]  }
   0x7   :  { %306 = vmatprep.subr.bf16.mxu1 %v482_v0  ;;  %v467_v19 = vld [vmem:[%s632_s0 + $0x28] sm:$0xff]   ;;  %v469_v20 = vld [vmem:[%s632_s0 + $0x70] sm:$0xff]   ;;  %v468_v21 = vld [vmem:[%s632_s0 + $0xb8] sm:$0xff]  }
   0x8   :  { %427 = vmatpush3.bf16.msra.mxu0 %v455_v7  ;;  %v470_v22 = vld [vmem:[%s632_s0 + $0x30] sm:$0xff]   ;;  %v472_v23 = vld [vmem:[%s632_s0 + $0x78] sm:$0xff]   ;;  %v343_v27 = vld [vmem:[%s634_s2] sm:$0xff] }
   0x9   :  { %428 = vmatprep.subr.bf16.mxu0 %v457_v8  ;;  %v476_v24 = vld [vmem:[%s633_s1 + $0x4] ss:$16 sps:$4 sm:$0xff]   ;;  %v473_v25 = vld [vmem:[%s632_s0 + $0x38] sm:$0xff]   ;;  %v474_v30 = vld [vmem:[%s633_s1] ss:$16 sps:$4 sm:$0xff]   ;;  %347 = vperm.xlu0 %447, %v343_v27  }
   0xa   :  { %307 = vmatpush1.bf16.msra.mxu1 %v453_v5  ;;  %293 = vmatprep.mubr.bf16.mxu0 %v476_v24  ;;  %v481_v26 = vld [vmem:[%s633_s1 + $0xc] ss:$16 sps:$4 sm:$0xff]   ;;  %v471_v28 = vld [vmem:[%s632_s0 + $0xc0] sm:$0xff]   ;;  %v478_v34 = vld [vmem:[%s632_s0 + $0xd0] sm:$0xff]  }
   0xb   :  { %308 = vmatprep.subr.bf16.mxu1 %v482_v0  ;;  %v357_v29 = vld [vmem:[%s635_s3] sm:$0xff]  ;;  %419 = vmatprep.mubr.msk.bf16.mxu1 %vm257_vm0, %v481_v26  ;;  %v344_v31 = vld [vmem:[%s634_s2 + $0x8] sm:$0xff] }
   0xc   :  { %429 = vmatpush3.bf16.msra.mxu0 %v458_v9  ;;  %361 = vperm.xlu1 %448, %v357_v29   ;;  %v477_v32 = vld [vmem:[%s632_s0 + $0xc8] sm:$0xff]  }
   0xd   :  { %430 = vmatprep.subr.bf16.mxu0 %v460_v11  ;;  %v358_v33 = vld [vmem:[%s635_s3 + $0x8] sm:$0xff]  ;;  %352 = vperm.xlu0 %447, %v344_v31  }
   0xe   :  { %309 = vmatpush1.bf16.msra.mxu1 %v456_v10  ;;  %v479_v35 = vld [vmem:[%s633_s1 + $0x8] ss:$16 sps:$4 sm:$0xff]  }
   0xf   :  { %310 = vmatprep.subr.bf16.mxu1 %v482_v0 }
  0x10   :  { %431 = vmatpush3.bf16.msra.mxu0 %v461_v13  ;;  %366 = vperm.xlu1 %448, %v358_v33  }
  0x11   :  { %432 = vmatprep.subr.bf16.mxu0 %v463_v14 }
  0x12   :  { %311 = vmatpush1.bf16.msra.mxu1 %v459_v12 }
  0x13   :  { %312 = vmatprep.subr.bf16.mxu1 %v482_v0 }
  0x14   :  { %433 = vmatpush3.bf16.msra.mxu0 %v464_v16 }
  0x15   :  { %434 = vmatprep.subr.bf16.mxu0 %v466_v17 }
  0x16   :  { %313 = vmatpush1.bf16.msra.mxu1 %v462_v15 }
  0x17   :  { %314 = vmatprep.subr.bf16.mxu1 %v482_v0 }
  0x18   :  { %435 = vmatpush3.bf16.msra.mxu0 %v467_v19 }
  0x19   :  { %436 = vmatprep.subr.bf16.mxu0 %v469_v20 }
  0x1a   :  { %315 = vmatpush1.bf16.msra.mxu1 %v465_v18 }
  0x1b   :  { %316 = vmatprep.subr.bf16.mxu1 %v482_v0 }
  0x1c   :  { %437 = vmatpush3.bf16.msra.mxu0 %v470_v22 }
  0x1d   :  { %438 = vmatprep.subr.bf16.mxu0 %v472_v23 }
  0x1e   :  { %317 = vmatpush1.bf16.msra.mxu1 %v468_v21 }
  0x1f   :  { %318 = vmatprep.subr.bf16.mxu1 %v482_v0 }
  0x20   :  { %439 = vmatpush3.bf16.msra.mxu0 %v473_v25 }
  0x22   :  { %319 = vmatpush1.bf16.msra.mxu1 %v471_v28 }
  0x23   :  { %320 = vmatprep.subr.bf16.mxu1 %v482_v0  ;;  %294 = vmatmul.mubr.bf16.vlgmr.msra.gmra.mrb[0].mxu0 %v474_v30 }
  0x26   :  { %321 = vmatpush1.bf16.msra.mxu1 %v477_v32 }
  0x27   :  { %322 = vmatprep.subr.bf16.mxu1 %v482_v0 }
  0x2a   :  { %323 = vmatpush1.bf16.msra.mxu1 %v478_v34 }
  0x2d   :  { %335 = vmatmul.mubr.bf16.vlgmr.msra.gmra.mrb[0].mxu1 %v479_v35 }
  0x88   :  { %v348_v42 = vpop.permute.xlu0 %347 }
  0x8b   :  { %v362_v43 = vpop.permute.xlu1 %361 }
  0x8c   :  { %v353_v51 = vpop.permute.xlu0 %352 }
  0x8f   :  { %v367_v54 = vpop.permute.xlu1 %366 }
  0xf6   :  { %v440_v36 = vpop.f32.mrb[0].mxu0 }
  0xf7   :  { %v441_v37 = vpop.f32.mrb[1].mxu0 }
  0xf8   :  { %v442_v38 = vadd.f32 %v441_v37, %v440_v36  ;;  %v443_v39 = vpop.f32.mrb[2].mxu0 }
  0xf9   :  { %v444_v40 = vpop.f32.mrb[3].mxu0 }
  0xfa   :  { %v445_v41 = vadd.f32 %v444_v40, %v443_v39 }
 0x100   :  { %v336_v44 = vpop.f32.mrb[0].mxu1 }
 0x101   :  { %v337_v45 = vadd.f32 %v442_v38, %v336_v44  ;;  %v338_v46 = vpop.f32.mrb[1].mxu1 }
 0x102   :  { %v339_v47 = vpop.f32.mrb[2].mxu1 }
 0x103   :  { %v355_v48 = vmul.f32 %v348_v42, %v337_v45  ;;  %v340_v49 = vadd.f32 %v445_v41, %v339_v47  ;;  %v341_v50 = vpop.f32.mrb[3].mxu1 }
 0x105   :  { %v369_v52 = vadd.f32 %v362_v43, %v355_v48  ;;  %v356_v53 = vmul.f32 %v353_v51, %v340_v49 }
 0x107   :  { %v371_v55 = vmax.f32 %v369_v52, 0.0  ;;  %v370_v56 = vadd.f32 %v367_v54, %v356_v53 }
 0x109   :  { %v422_v57 = vpack.c.bf16 %v371_v55, %v371_v55  ;;  %v372_v58 = vmax.f32 %v370_v56, 0.0 }
 0x10b   :  { %382 = vst.msk [vmem:[%s636_s4] sm:$0xf] %vm381_vm1, %v422_v57  ;;  %v423_v59 = vpack.c.bf16 %v372_v58, %v372_v58 }
 0x10d   :  { %383 = vst.msk [vmem:[%s636_s4 + $0x4] sm:$0xf] %vm381_vm1, %v423_v59 }

// kernel: hourglass_forward.14
= control target key start
LH: loop header
LB: loop body
LE: loop exit
PB: predicated region body
PF: predicated region fallthrough
CT: control target
= control target key end

     0   :  { %v447_v0 = vmov 0   ;;  %vm252_vm0 = vcmask 392192   ;;  %s589_s0 = inlined_call_operand.vmem [shape: bf16[432,128], index: 0, kind: input, shape index: {}]   ;;  %s590_s1 = inlined_call_operand.vmem [shape: bf16[8,432], index: 1, kind: input, shape index: {}]   ;;  %s591_s2 = inlined_call_operand.vmem [shape: f32[8,1], index: 2, kind: input, shape index: {}]   ;;  %s592_s3 = inlined_call_operand.vmem [shape: f32[8,1], index: 3, kind: input, shape index: {}]   ;;  %s593_s4 = inlined_call_operand.vmem [shape: bf16[8,128], index: 4, kind: input, shape index: {}]   ;;  %s594_s5 = inlined_call_operand.vmem [shape: bf16[8,128], index: 5, kind: output, shape index: {}]  }
   0x1   :  { %296 = vmatprep.subr.bf16.mxu1 %v447_v0  ;;  %v416_v1 = vld [vmem:[%s589_s0 + $0x80] sm:$0xff]   ;;  %415 = vset.pattern.permute.xlu0 %v447_v0  ;;  %v417_v2 = vld [vmem:[%s589_s0 + $0x88] sm:$0xff]   ;;  %v420_v5 = vld [vmem:[%s589_s0 + $0x90] sm:$0xff]  }
   0x2   :  { %297 = vmatpush1.bf16.msra.mxu1 %v416_v1  ;;  %v418_v3 = vld [vmem:[%s589_s0 + $0x40] sm:$0xff]   ;;  %v421_v6 = vld [vmem:[%s589_s0 + $0x48] sm:$0xff]   ;;  %v424_v8 = vld [vmem:[%s589_s0 + $0x50] sm:$0xff]  }
   0x3   :  { %298 = vmatprep.subr.bf16.mxu1 %v447_v0  ;;  %v419_v4 = vld [vmem:[%s589_s0] sm:$0xff]   ;;  %392 = vmatprep.subr.bf16.mxu0 %v418_v3  ;;  %v422_v7 = vld [vmem:[%s589_s0 + $0x8] sm:$0xff]   ;;  %v425_v9 = vld [vmem:[%s589_s0 + $0x10] sm:$0xff]  }
   0x4   :  { %393 = vmatpush3.bf16.msra.mxu0 %v419_v4  ;;  %v423_v10 = vld [vmem:[%s589_s0 + $0x98] sm:$0xff]   ;;  %v426_v12 = vld [vmem:[%s589_s0 + $0xa0] sm:$0xff]   ;;  %v429_v15 = vld [vmem:[%s589_s0 + $0xa8] sm:$0xff]  }
   0x5   :  { %394 = vmatprep.subr.bf16.mxu0 %v421_v6  ;;  %v427_v11 = vld [vmem:[%s589_s0 + $0x58] sm:$0xff]   ;;  %v430_v14 = vld [vmem:[%s589_s0 + $0x60] sm:$0xff]   ;;  %v433_v17 = vld [vmem:[%s589_s0 + $0x68] sm:$0xff]  }
   0x6   :  { %299 = vmatpush1.bf16.msra.mxu1 %v417_v2  ;;  %v428_v13 = vld [vmem:[%s589_s0 + $0x18] sm:$0xff]   ;;  %v431_v16 = vld [vmem:[%s589_s0 + $0x20] sm:$0xff]   ;;  %v432_v18 = vld [vmem:[%s589_s0 + $0xb0] sm:$0xff]  }
   0x7   :  { %300 = vmatprep.subr.bf16.mxu1 %v447_v0  ;;  %v434_v19 = vld [vmem:[%s589_s0 + $0x28] sm:$0xff]   ;;  %v436_v20 = vld [vmem:[%s589_s0 + $0x70] sm:$0xff]   ;;  %v435_v21 = vld [vmem:[%s589_s0 + $0xb8] sm:$0xff]  }
   0x8   :  { %395 = vmatpush3.bf16.msra.mxu0 %v422_v7  ;;  %v437_v22 = vld [vmem:[%s589_s0 + $0x30] sm:$0xff]   ;;  %v21_v23 = vld [vmem:[%s590_s1] sm:$0xff]  ;;  %v439_v24 = vld [vmem:[%s589_s0 + $0x78] sm:$0xff]  }
   0x9   :  { %396 = vmatprep.subr.bf16.mxu0 %v424_v8  ;;  %v361_v25 = vcombine.high %v21_v23, %v21_v23  ;;  %v22_v26 = vld [vmem:[%s590_s1 + $0x8] sm:$0xff]  ;;  %v336_v27 = vld [vmem:[%s591_s2] sm:$0xff]  ;;  %v440_v29 = vld [vmem:[%s589_s0 + $0x38] sm:$0xff]   ;;  %v360_v32 = vcombine.low %v21_v23, %v21_v23 }
   0xa   :  { %301 = vmatpush1.bf16.msra.mxu1 %v420_v5  ;;  %v363_v28 = vcombine.high %v22_v26, %v22_v26  ;;  %339 = vperm.xlu0 %415, %v336_v27   ;;  %v343_v30 = vld [vmem:[%s592_s3] sm:$0xff]  ;;  %v443_v33 = vld [vmem:[%s589_s0 + $0xc8] sm:$0xff]   ;;  %v444_v34 = vld [vmem:[%s589_s0 + $0xd0] sm:$0xff]   ;;  %v362_v35 = vcombine.low %v22_v26, %v22_v26 }
   0xb   :  { %302 = vmatprep.subr.bf16.mxu1 %v447_v0  ;;  %288 = vmatprep.mubr.bf16.mxu0 %v361_v25  ;;  %v438_v31 = vld [vmem:[%s589_s0 + $0xc0] sm:$0xff]  }
   0xc   :  { %397 = vmatpush3.bf16.msra.mxu0 %v425_v9  ;;  %391 = vmatprep.mubr.msk.bf16.mxu1 %vm252_vm0, %v363_v28  ;;  %v350_v43 = vld [vmem:[%s593_s4] sm:$0xf] }
   0xd   :  { %398 = vmatprep.subr.bf16.mxu0 %v427_v11  ;;  %v351_v48 = vunpack.c.l.bf16 %v350_v43 }
   0xe   :  { %303 = vmatpush1.bf16.msra.mxu1 %v423_v10  ;;  %346 = vperm.xlu0 %415, %v343_v30  }
   0xf   :  { %304 = vmatprep.subr.bf16.mxu1 %v447_v0 }
  0x10   :  { %399 = vmatpush3.bf16.msra.mxu0 %v428_v13 }
  0x11   :  { %400 = vmatprep.subr.bf16.mxu0 %v430_v14 }
  0x12   :  { %305 = vmatpush1.bf16.msra.mxu1 %v426_v12 }
  0x13   :  { %306 = vmatprep.subr.bf16.mxu1 %v447_v0 }
  0x14   :  { %401 = vmatpush3.bf16.msra.mxu0 %v431_v16 }
  0x15   :  { %402 = vmatprep.subr.bf16.mxu0 %v433_v17 }
  0x16   :  { %307 = vmatpush1.bf16.msra.mxu1 %v429_v15 }
  0x17   :  { %308 = vmatprep.subr.bf16.mxu1 %v447_v0 }
  0x18   :  { %403 = vmatpush3.bf16.msra.mxu0 %v434_v19 }
  0x19   :  { %404 = vmatprep.subr.bf16.mxu0 %v436_v20 }
  0x1a   :  { %309 = vmatpush1.bf16.msra.mxu1 %v432_v18 }
  0x1b   :  { %310 = vmatprep.subr.bf16.mxu1 %v447_v0 }
  0x1c   :  { %405 = vmatpush3.bf16.msra.mxu0 %v437_v22 }
  0x1d   :  { %406 = vmatprep.subr.bf16.mxu0 %v439_v24 }
  0x1e   :  { %311 = vmatpush1.bf16.msra.mxu1 %v435_v21 }
  0x1f   :  { %312 = vmatprep.subr.bf16.mxu1 %v447_v0 }
  0x20   :  { %407 = vmatpush3.bf16.msra.mxu0 %v440_v29 }
  0x22   :  { %313 = vmatpush1.bf16.msra.mxu1 %v438_v31 }
  0x23   :  { %314 = vmatprep.subr.bf16.mxu1 %v447_v0  ;;  %289 = vmatmul.mubr.bf16.vlgmr.msra.gmra.mrb[0].mxu0 %v360_v32 }
  0x26   :  { %315 = vmatpush1.bf16.msra.mxu1 %v443_v33 }
  0x27   :  { %316 = vmatprep.subr.bf16.mxu1 %v447_v0 }
  0x2a   :  { %317 = vmatpush1.bf16.msra.mxu1 %v444_v34 }
  0x2d   :  { %329 = vmatmul.mubr.bf16.vlgmr.msra.gmra.mrb[0].mxu1 %v362_v35 }
  0x89   :  { %v340_v41 = vpop.permute.xlu0 %339 }
  0x8d   :  { %v347_v50 = vpop.permute.xlu0 %346 }
  0xf6   :  { %v408_v36 = vpop.f32.mrb[0].mxu0 }
  0xf7   :  { %v409_v37 = vpop.f32.mrb[1].mxu0 }
  0xf8   :  { %v410_v38 = vadd.f32 %v409_v37, %v408_v36  ;;  %v411_v39 = vpop.f32.mrb[2].mxu0 }
  0xf9   :  { %v412_v40 = vpop.f32.mrb[3].mxu0 }
 0x100   :  { %v330_v42 = vpop.f32.mrb[0].mxu1 }
 0x101   :  { %v331_v44 = vadd.f32 %v410_v38, %v330_v42  ;;  %v332_v45 = vpop.f32.mrb[1].mxu1 }
 0x102   :  { %v333_v46 = vpop.f32.mrb[2].mxu1 }
 0x103   :  { %v342_v47 = vmul.f32 %v340_v41, %v331_v44  ;;  %v334_v49 = vpop.f32.mrb[3].mxu1 }
 0x105   :  { %v349_v51 = vadd.f32 %v347_v50, %v342_v47 }
 0x107   :  { %v352_v52 = vadd.f32 %v351_v48, %v349_v51 }
 0x109   :  { %v353_v53 = vmax.f32 %v352_v52, 0.0 }
 0x10b   :  { %v354_v54 = vpack.c.bf16 %v353_v53, %v353_v53 }
 0x10d   :  { %355 = vst [vmem:[%s594_s5] sm:$0xf] %v354_v54 }

// kernel: hourglass_forward.15
= control target key start
LH: loop header
LB: loop body
LE: loop exit
PB: predicated region body
PF: predicated region fallthrough
CT: control target
= control target key end

     0   :  { %v647_v1 = vmov 0   ;;  %vm356_vm0 = vcmask 719872   ;;  %vm360_vm1 = vcmask 1043456   ;;  %s858_s0 = inlined_call_operand.vmem [shape: bf16[216,512], index: 0, kind: input, shape index: {}]   ;;  %s859_s1 = inlined_call_operand.vmem [shape: bf16[4,216], index: 1, kind: input, shape index: {}]   ;;  %s860_s2 = inlined_call_operand.vmem [shape: f32[4,1], index: 2, kind: input, shape index: {}]   ;;  %s861_s3 = inlined_call_operand.vmem [shape: f32[4,1], index: 3, kind: input, shape index: {}]   ;;  %s862_s4 = inlined_call_operand.vmem [shape: bf16[4,512], index: 4, kind: input, shape index: {}]   ;;  %s863_s5 = inlined_call_operand.vmem [shape: f32[4,512], index: 5, kind: output, shape index: {}]  }
   0x1   :  { %v565_v0 = vld [vmem:[%s858_s0 + $0x4] ss:$16 sps:$4 sm:$0xff]   ;;  %564 = vset.pattern.permute.xlu0 %v647_v1  ;;  %v567_v2 = vld [vmem:[%s858_s0 + $0xc] ss:$16 sps:$4 sm:$0xff]   ;;  %v569_v3 = vld [vmem:[%s858_s0] ss:$16 sps:$4 sm:$0xff]  }
   0x2   :  { %373 = vmatprep.subr.bf16.mxu0 %v565_v0  ;;  %v570_v4 = vld [vmem:[%s858_s0 + $0x8] ss:$16 sps:$4 sm:$0xff]   ;;  %414 = vmatprep.subr.bf16.mxu1 %v567_v2  ;;  %v571_v5 = vld [vmem:[%s858_s0 + $0x24] ss:$16 sps:$4 sm:$0xff]   ;;  %v573_v6 = vld [vmem:[%s858_s0 + $0x2c] ss:$16 sps:$4 sm:$0xff]  }
   0x3   :  { %374 = vmatpush1.bf16.msra.mxu0 %v569_v3  ;;  %415 = vmatpush1.bf16.msra.mxu1 %v570_v4  ;;  %v575_v7 = vld [vmem:[%s858_s0 + $0x20] ss:$16 sps:$4 sm:$0xff]   ;;  %v576_v8 = vld [vmem:[%s858_s0 + $0x28] ss:$16 sps:$4 sm:$0xff]   ;;  %v577_v9 = vld [vmem:[%s858_s0 + $0x44] ss:$16 sps:$4 sm:$0xff]  }
   0x4   :  { %375 = vmatprep.subr.bf16.mxu0 %v571_v5  ;;  %416 = vmatprep.subr.bf16.mxu1 %v573_v6  ;;  %v579_v10 = vld [vmem:[%s858_s0 + $0x4c] ss:$16 sps:$4 sm:$0xff]   ;;  %v581_v11 = vld [vmem:[%s858_s0 + $0x40] ss:$16 sps:$4 sm:$0xff]   ;;  %v582_v12 = vld [vmem:[%s858_s0 + $0x48] ss:$16 sps:$4 sm:$0xff]  }
   0x5   :  { %v583_v13 = vld [vmem:[%s858_s0 + $0x64] ss:$16 sps:$4 sm:$0xff]   ;;  %v585_v14 = vld [vmem:[%s858_s0 + $0x6c] ss:$16 sps:$4 sm:$0xff]   ;;  %v587_v15 = vld [vmem:[%s858_s0 + $0x60] ss:$16 sps:$4 sm:$0xff]  }
   0x6   :  { %v588_v16 = vld [vmem:[%s858_s0 + $0x68] ss:$16 sps:$4 sm:$0xff]   ;;  %v589_v17 = vld [vmem:[%s858_s0 + $0x84] ss:$16 sps:$4 sm:$0xff]   ;;  %v591_v18 = vld [vmem:[%s858_s0 + $0x8c] ss:$16 sps:$4 sm:$0xff]  }
   0x7   :  { %376 = vmatpush1.bf16.msra.mxu0 %v575_v7  ;;  %417 = vmatpush1.bf16.msra.mxu1 %v576_v8  ;;  %v593_v19 = vld [vmem:[%s858_s0 + $0x80] ss:$16 sps:$4 sm:$0xff]   ;;  %v594_v20 = vld [vmem:[%s858_s0 + $0x88] ss:$16 sps:$4 sm:$0xff]   ;;  %v595_v21 = vld [vmem:[%s858_s0 + $0xa4] ss:$16 sps:$4 sm:$0xff]  }
   0x8   :  { %377 = vmatprep.subr.bf16.mxu0 %v577_v9  ;;  %418 = vmatprep.subr.bf16.mxu1 %v579_v10  ;;  %v597_v22 = vld [vmem:[%s858_s0 + $0xac] ss:$16 sps:$4 sm:$0xff]   ;;  %v599_v23 = vld [vmem:[%s858_s0 + $0xa0] ss:$16 sps:$4 sm:$0xff]   ;;  %v600_v24 = vld [vmem:[%s858_s0 + $0xa8] ss:$16 sps:$4 sm:$0xff]  }
   0x9   :  { %v601_v25 = vld [vmem:[%s858_s0 + $0xc4] ss:$16 sps:$4 sm:$0xff]   ;;  %v603_v26 = vld [vmem:[%s858_s0 + $0xcc] ss:$16 sps:$4 sm:$0xff]   ;;  %v605_v27 = vld [vmem:[%s858_s0 + $0xc0] ss:$16 sps:$4 sm:$0xff]  }
   0xa   :  { %v606_v28 = vld [vmem:[%s858_s0 + $0xc8] ss:$16 sps:$4 sm:$0xff]   ;;  %v607_v29 = vld [vmem:[%s858_s0 + $0xe4] ss:$16 sps:$4 sm:$0xff]   ;;  %v609_v30 = vld [vmem:[%s858_s0 + $0xec] ss:$16 sps:$4 sm:$0xff]  }
   0xb   :  { %378 = vmatpush1.bf16.msra.mxu0 %v581_v11  ;;  %419 = vmatpush1.bf16.msra.mxu1 %v582_v12  ;;  %v611_v31 = vld [vmem:[%s858_s0 + $0xe0] ss:$16 sps:$4 sm:$0xff]   ;;  %v612_v32 = vld [vmem:[%s858_s0 + $0xe8] ss:$16 sps:$4 sm:$0xff]   ;;  %v613_v33 = vld [vmem:[%s858_s0 + $0x104] ss:$16 sps:$4 sm:$0xff]  }
   0xc   :  { %379 = vmatprep.subr.bf16.mxu0 %v583_v13  ;;  %420 = vmatprep.subr.bf16.mxu1 %v585_v14  ;;  %v615_v34 = vld [vmem:[%s858_s0 + $0x10c] ss:$16 sps:$4 sm:$0xff]   ;;  %v617_v35 = vld [vmem:[%s858_s0 + $0x100] ss:$16 sps:$4 sm:$0xff]   ;;  %v618_v36 = vld [vmem:[%s858_s0 + $0x108] ss:$16 sps:$4 sm:$0xff]  }
   0xd   :  { %v619_v37 = vld [vmem:[%s858_s0 + $0x124] ss:$16 sps:$4 sm:$0xff]   ;;  %v621_v38 = vld [vmem:[%s858_s0 + $0x12c] ss:$16 sps:$4 sm:$0xff]   ;;  %v623_v40 = vld [vmem:[%s858_s0 + $0x120] ss:$16 sps:$4 sm:$0xff]  }
   0xe   :  { %v502_v39 = vld.sshfl [vmem:[%s859_s1] sm:$0x33 pattern:$0x76325410]  ;;  %v624_v41 = vld [vmem:[%s858_s0 + $0x128] ss:$16 sps:$4 sm:$0xff]  }
   0xf   :  { %380 = vmatpush1.bf16.msra.mxu0 %v587_v15  ;;  %421 = vmatpush1.bf16.msra.mxu1 %v588_v16  ;;  %v84_v42 = vcombine.high %v502_v39, %v502_v39  ;;  %v455_v43 = vld [vmem:[%s860_s2] sm:$0xf]  ;;  %v625_v44 = vld [vmem:[%s858_s0 + $0x144] ss:$16 sps:$4 sm:$0xff]   ;;  %v627_v45 = vld [vmem:[%s858_s0 + $0x14c] ss:$16 sps:$4 sm:$0xff]  }
  0x10   :  { %381 = vmatprep.subr.bf16.mxu0 %v589_v17  ;;  %422 = vmatprep.subr.bf16.mxu1 %v591_v18  ;;  %v629_v46 = vld [vmem:[%s858_s0 + $0x140] ss:$16 sps:$4 sm:$0xff]   ;;  %v630_v47 = vld [vmem:[%s858_s0 + $0x148] ss:$16 sps:$4 sm:$0xff]   ;;  %v631_v49 = vld [vmem:[%s858_s0 + $0x164] ss:$16 sps:$4 sm:$0xff]  }
  0x11   :  { %560 = vmatprep.mubr.msk.bf16.mxu0 %vm356_vm0, %v84_v42  ;;  %562 = vmatprep.mubr.msk.bf16.mxu1 %vm356_vm0, %v84_v42  ;;  %v465_v48 = vld [vmem:[%s861_s3] sm:$0xf]  ;;  %v633_v50 = vld [vmem:[%s858_s0 + $0x16c] ss:$16 sps:$4 sm:$0xff]   ;;  %v636_v52 = vld [vmem:[%s858_s0 + $0x168] ss:$16 sps:$4 sm:$0xff]  }
  0x12   :  { %458 = vperm.xlu0 %564, %v455_v43   ;;  %v635_v51 = vld [vmem:[%s858_s0 + $0x160] ss:$16 sps:$4 sm:$0xff]   ;;  %v637_v53 = vld [vmem:[%s858_s0 + $0x184] ss:$16 sps:$4 sm:$0xff]   ;;  %v639_v54 = vld [vmem:[%s858_s0 + $0x18c] ss:$16 sps:$4 sm:$0xff]  }
  0x13   :  { %382 = vmatpush1.bf16.msra.mxu0 %v593_v19  ;;  %423 = vmatpush1.bf16.msra.mxu1 %v594_v20  ;;  %v74_v55 = vld [vmem:[%s858_s0 + $0x1a0] sm:$0xff]  ;;  %v75_v56 = vld [vmem:[%s858_s0 + $0x1a8] sm:$0xff] }
  0x14   :  { %383 = vmatprep.subr.bf16.mxu0 %v595_v21  ;;  %424 = vmatprep.subr.bf16.mxu1 %v597_v22  ;;  %v641_v57 = vld [vmem:[%s858_s0 + $0x180] ss:$16 sps:$4 sm:$0xff]   ;;  %v642_v58 = vld [vmem:[%s858_s0 + $0x188] ss:$16 sps:$4 sm:$0xff]   ;;  %v556_v59 = vcombine.high %v74_v55, %v74_v55  ;;  %v558_v60 = vcombine.high %v75_v56, %v75_v56  ;;  %v555_v61 = vcombine.low %v74_v55, %v74_v55 }
  0x15   :  { %v557_v62 = vcombine.low %v75_v56, %v75_v56  ;;  %v475_v2 = vld [vmem:[%s862_s4] sm:$0xff] }
  0x16   :  { %468 = vperm.xlu0 %564, %v465_v48   ;;  %v362_v63 = vsel %vm360_vm1, %v555_v61, 0  ;;  %v476_v3 = vunpack.c.l.bf16 %v475_v2  ;;  %v477_v4 = vunpack.c.h.bf16 %v475_v2 }
  0x17   :  { %384 = vmatpush1.bf16.msra.mxu0 %v599_v23  ;;  %425 = vmatpush1.bf16.msra.mxu1 %v600_v24  ;;  %v368_v0 = vsel %vm360_vm1, %v557_v62, 0 }
  0x18   :  { %385 = vmatprep.subr.bf16.mxu0 %v601_v25  ;;  %426 = vmatprep.subr.bf16.mxu1 %v603_v26  ;;  %v480_v13 = vcombine.high %v476_v3, %v476_v3  ;;  %v481_v15 = vcombine.high %v477_v4, %v477_v4 }
  0x1b   :  { %386 = vmatpush1.bf16.msra.mxu0 %v605_v27  ;;  %427 = vmatpush1.bf16.msra.mxu1 %v606_v28 }
  0x1c   :  { %387 = vmatprep.subr.bf16.mxu0 %v607_v29  ;;  %428 = vmatprep.subr.bf16.mxu1 %v609_v30 }
  0x1f   :  { %388 = vmatpush1.bf16.msra.mxu0 %v611_v31  ;;  %429 = vmatpush1.bf16.msra.mxu1 %v612_v32 }
  0x20   :  { %389 = vmatprep.subr.bf16.mxu0 %v613_v33  ;;  %430 = vmatprep.subr.bf16.mxu1 %v615_v34 }
  0x23   :  { %390 = vmatpush1.bf16.msra.mxu0 %v617_v35  ;;  %431 = vmatpush1.bf16.msra.mxu1 %v618_v36 }
  0x24   :  { %391 = vmatprep.subr.bf16.mxu0 %v619_v37  ;;  %432 = vmatprep.subr.bf16.mxu1 %v621_v38 }
  0x27   :  { %392 = vmatpush1.bf16.msra.mxu0 %v623_v40  ;;  %433 = vmatpush1.bf16.msra.mxu1 %v624_v41 }
  0x28   :  { %393 = vmatprep.subr.bf16.mxu0 %v625_v44  ;;  %434 = vmatprep.subr.bf16.mxu1 %v627_v45 }
  0x2b   :  { %394 = vmatpush1.bf16.msra.mxu0 %v629_v46  ;;  %435 = vmatpush1.bf16.msra.mxu1 %v630_v47 }
  0x2c   :  { %395 = vmatprep.subr.bf16.mxu0 %v631_v49  ;;  %436 = vmatprep.subr.bf16.mxu1 %v633_v50 }
  0x2f   :  { %396 = vmatpush1.bf16.msra.mxu0 %v635_v51  ;;  %437 = vmatpush1.bf16.msra.mxu1 %v636_v52 }
  0x30   :  { %397 = vmatprep.subr.bf16.mxu0 %v637_v53  ;;  %438 = vmatprep.subr.bf16.mxu1 %v639_v54 }
  0x33   :  { %398 = vmatpush1.bf16.msra.mxu0 %v641_v57  ;;  %439 = vmatpush1.bf16.msra.mxu1 %v642_v58 }
  0x34   :  { %559 = vmatprep.subr.msk.bf16.mxu0 %vm360_vm1, %v556_v59  ;;  %561 = vmatprep.subr.msk.bf16.mxu1 %vm360_vm1, %v558_v60 }
  0x37   :  { %400 = vmatpush1.bf16.msra.mxu0 %v362_v63  ;;  %441 = vmatpush1.bf16.msra.mxu1 %v368_v0 }
  0x3a   :  { %406 = vmatmul.mubr.bf16.vlgmr.msra.gmra.mrb[0].mxu0 %v502_v39  ;;  %447 = vmatmul.mubr.bf16.vlgmr.msra.gmra.mrb[0].mxu1 %v502_v39 }
  0x91   :  { %v459_v1 = vpop.permute.xlu0 %458 }
  0x95   :  { %v469_v5 = vpop.permute.xlu0 %468 }
 0x10d   :  { %v407_v6 = vpop.f32.mrb[0].mxu0  ;;  %v448_v7 = vpop.f32.mrb[0].mxu1 }
 0x10e   :  { %v461_v8 = vmul.f32 %v459_v1, %v407_v6  ;;  %v463_v9 = vmul.f32 %v459_v1, %v448_v7  ;;  %v409_v10 = vpop.f32.mrb[1].mxu0  ;;  %v450_v11 = vpop.f32.mrb[1].mxu1 }
 0x10f   :  { %v462_v12 = vmul.f32 %v459_v1, %v409_v10  ;;  %v464_v14 = vmul.f32 %v459_v1, %v450_v11  ;;  %v411_v16 = vpop.f32.mrb[2].mxu0  ;;  %v452_v17 = vpop.f32.mrb[2].mxu1 }
 0x110   :  { %v471_v18 = vadd.f32 %v469_v5, %v461_v8  ;;  %v473_v19 = vadd.f32 %v469_v5, %v463_v9  ;;  %v412_v20 = vpop.f32.mrb[3].mxu0  ;;  %v453_v21 = vpop.f32.mrb[3].mxu1 }
 0x111   :  { %v472_v22 = vadd.f32 %v469_v5, %v462_v12  ;;  %v474_v23 = vadd.f32 %v469_v5, %v464_v14 }
 0x112   :  { %v484_v24 = vadd.f32 %v476_v3, %v471_v18  ;;  %v486_v25 = vadd.f32 %v477_v4, %v473_v19 }
 0x113   :  { %v485_v26 = vadd.f32 %v480_v13, %v472_v22  ;;  %v487_v27 = vadd.f32 %v481_v15, %v474_v23 }
 0x115   :  { %v492_v28 = vcombine.low %v484_v24, %v485_v26  ;;  %v493_v29 = vcombine.low %v486_v25, %v487_v27 }
 0x117   :  { %496 = vst [vmem:[%s863_s5] sm:$0xff] %v492_v28  ;;  %497 = vst [vmem:[%s863_s5 + $0x8] sm:$0xff] %v493_v29 }

</bundles_post_ra>
